<compile_context>
chip_gen: v7x
topology: tpu7x:2x2x1
jax: 0.10.0
libtpu: 0.0.40
codegen_flags: <defaults>
</compile_context>

<pallas_src>
import jax
import jax.numpy as jnp
import numpy as np
from jax.experimental import pallas as pl
from jax.experimental.pallas import tpu as pltpu


_VMEM_LIMIT_BYTES = 32 * 1024 * 1024   # safe scoped-VMEM budget on v5e/v6e/v7x
_GEMM_INPUT_DTYPE = jnp.float32        # jnp.bfloat16 on v6e/v7x for ~2x MXU rate


def _pick_batch_tile(n, rows_per_image, itemsize, target_bytes=4 << 20):
    """Largest divisor-of-N batch tile with a ~4 MiB block, keeping >=2 grid
    steps when possible so both v7x TensorCores get work."""
    per_image = rows_per_image * 128 * itemsize
    tb = int(max(1, min(n, target_bytes // max(per_image, 1))))
    while n % tb:
        tb -= 1
    if n >= 2 and n // tb < 2:
        tb = max(1, n // 2)
        while n % tb:
            tb -= 1
    return tb


# ------------------------------ fused kernel --------------------------------

def _fused_disc_kernel(p1_ref, w1_ref, b1_ref, w2_ref, b2_ref, o_ref,
                       p00, p01, p10, p11):
    # p1_ref : [TB*4*H2*W2, 128]   conv1 im2col patches, M = (n, rowpar, colpar, y, x)
    # w1_ref : [128, 64], b1_ref: [1, 64]
    # w2_ref : [16, 64] (rows = kh*4+kw), b2_ref: [1, 1]
    # o_ref  : [TB, H2, W2]
    # pXY    : VMEM phase planes [TB, H2+1, W2+1, 64] for conv2 (zero borders)
    TB, H2, W2 = o_ref.shape
    C1 = w1_ref.shape[1]

    # ---- conv1: single MXU GEMM + bias + LeakyReLU(0.2), f32 accumulate ----
    acc = jnp.dot(p1_ref[...], w1_ref[...], preferred_element_type=jnp.float32)
    acc = acc + b1_ref[...]
    h = jnp.where(acc >= 0.0, acc, 0.2 * acc)          # [TB*4*H2*W2, C1]
    h = h.reshape(TB, 4, H2, W2, C1)                   # (n, 2*rowpar+colpar, y, x, c)

    # ---- scatter parity blocks into zero-bordered conv2 phase planes -------
    # plane[rh, rw][u, v] == h_pad[2u+rh, 2v+rw]  (h_pad = conv2's zero-padded input)
    p00[...] = jnp.zeros_like(p00)
    p01[...] = jnp.zeros_like(p01)
    p10[...] = jnp.zeros_like(p10)
    p11[...] = jnp.zeros_like(p11)
    p00[:, 1:, 1:, :] = h[:, 3]        # odd rows,  odd cols
    p01[:, 1:, :W2, :] = h[:, 2]       # odd rows,  even cols
    p10[:, :H2, 1:, :] = h[:, 1]       # even rows, odd cols
    p11[:, :H2, :W2, :] = h[:, 0]      # even rows, even cols

    # ---- conv2 (Cout=1): 16 unit-stride windows, VPU mults + lane reduce ----
    planes = ((p00, p01), (p10, p11))                  # planes[rh][rw]
    w2 = w2_ref[...]                                   # [16, C1]
    acc2 = jnp.zeros((TB, H2, W2, C1), jnp.float32)
    for kh in range(4):
        rh, ph = kh % 2, kh // 2
        for kw in range(4):
            rw, pw = kw % 2, kw // 2
            window = planes[rh][rw][:, ph:ph + H2, pw:pw + W2, :]
            acc2 = acc2 + window * w2[kh * 4 + kw].reshape(1, 1, 1, C1)
    logits = jnp.sum(acc2, axis=-1) + b2_ref[...]      # [TB, H2, W2]
    o_ref[...] = 1.0 / (1.0 + jnp.exp(-logits))        # sigmoid (exp on EUP)


# ------------------- wrapper-side im2col (parity-grouped) -------------------

def _conv1_patches_parity(z):
    """z: [N, H, W, 8] -> conv1 im2col patches [N*4*H2*W2, 128] with the M axis
    ordered (n, row-parity, col-parity, y, x) so the fused kernel's stride-2
    second conv only needs unit-stride windows."""
    N, H, W, C = z.shape
    H1, W1 = H // 2, W // 2
    H2, W2 = H1 // 2, W1 // 2
    zp = jnp.pad(z, ((0, 0), (1, 1), (1, 1), (0, 0)))
    cols = []
    for kh in range(4):
        for kw in range(4):
            cols.append(zp[:, kh:kh + 2 * H1:2, kw:kw + 2 * W1:2, :])
    pat = jnp.stack(cols, axis=3)                      # [N, H1, W1, 16, C]
    pat = pat.reshape(N, H2, 2, W2, 2, 16 * C)         # split row/col parity
    pat = pat.transpose(0, 2, 4, 1, 3, 5)              # [N, 2, 2, H2, W2, 128]
    return pat.reshape(N * 4 * H2 * W2, 16 * C), H2, W2


# --------------------------------- forward ----------------------------------

def discriminator_forward(x, y, params):
    """x, y: [N, 3, H, W] float32 (NCHW, PyTorch layout). Returns [N, 1, H//4, W//4]."""
    w1, b1, w2, b2 = params
    N, _, H, W = x.shape
    assert H % 4 == 0 and W % 4 == 0, "spatial dims must be divisible by 4"
    C1 = w1.shape[0]                                   # 64

    # NCHW -> NHWC, concat, pad channels 6->8 so K = 4*4*8 = 128 exactly.
    z = jnp.concatenate([jnp.transpose(x, (0, 2, 3, 1)),
                         jnp.transpose(y, (0, 2, 3, 1))], axis=-1)
    z = jnp.pad(z, ((0, 0), (0, 0), (0, 0), (0, 2)))

    # TODO(synk): fold this im2col into the kernel (mod-4 input phase planes)
    # to avoid materialising the 4x-inflated patch matrix in HBM.
    p1, H2, W2 = _conv1_patches_parity(z)
    MB = 4 * H2 * W2                                   # GEMM rows per image

    # parameters in kernel layout
    w1m = jnp.pad(w1, ((0, 0), (0, 2), (0, 0), (0, 0)))          # [64, 8, 4, 4]
    w1m = jnp.transpose(w1m, (2, 3, 1, 0)).reshape(128, C1)      # K=(kh,kw,ci)
    b1m = b1.reshape(1, C1).astype(jnp.float32)
    w2m = jnp.transpose(w2[0], (1, 2, 0)).reshape(16, C1).astype(jnp.float32)
    b2m = b2.reshape(1, 1).astype(jnp.float32)

    TB = _pick_batch_tile(N, MB, jnp.dtype(_GEMM_INPUT_DTYPE).itemsize)
    grid = (N // TB,)

    out = pl.pallas_call(
        _fused_disc_kernel,
        out_shape=jax.ShapeDtypeStruct((N, H2, W2), jnp.float32),
        grid=grid,
        in_specs=[
            pl.BlockSpec((TB * MB, 128), lambda i: (i, 0)),
            pl.BlockSpec((128, C1), lambda i: (0, 0)),
            pl.BlockSpec((1, C1), lambda i: (0, 0)),
            pl.BlockSpec((16, C1), lambda i: (0, 0)),
            pl.BlockSpec((1, 1), lambda i: (0, 0)),
        ],
        out_specs=pl.BlockSpec((TB, H2, W2), lambda i: (i, 0, 0)),
        scratch_shapes=[pltpu.VMEM((TB, H2 + 1, W2 + 1, C1), jnp.float32)
                        for _ in range(4)],
        compiler_params=pltpu.CompilerParams(
            dimension_semantics=("parallel",),
            vmem_limit_bytes=_VMEM_LIMIT_BYTES),
    )(p1.astype(_GEMM_INPUT_DTYPE), w1m.astype(_GEMM_INPUT_DTYPE),
      b1m, w2m, b2m)

    return out.reshape(N, 1, H2, W2)                   # NCHW (channel dim is 1)


# -------------------------------- reference ----------------------------------

def _reference_forward(x, y, params):
    """Pure-JAX reference for correctness checking."""
    w1, b1, w2, b2 = params
    z = jnp.concatenate([x, y], axis=1)
    dn = ("NCHW", "OIHW", "NCHW")
    h = jax.lax.conv_general_dilated(z, w1, (2, 2), [(1, 1), (1, 1)],
                                     dimension_numbers=dn)
    h = h + b1.reshape(1, -1, 1, 1)
    h = jnp.where(h >= 0.0, h, 0.2 * h)
    o = jax.lax.conv_general_dilated(h, w2, (2, 2), [(1, 1), (1, 1)],
                                     dimension_numbers=dn)
    o = o + b2.reshape(1, -1, 1, 1)
    return jax.nn.sigmoid(o)


if __name__ == "__main__":
    key = jax.random.PRNGKey(0)
    kx, ky, k1, k2, k3, k4 = jax.random.split(key, 6)

    N, H, W = 2, 32, 32
    x = jax.random.normal(kx, (N, 3, H, W), dtype=jnp.float32)
    y = jax.random.normal(ky, (N, 3, H, W), dtype=jnp.float32)

    # deterministic parameter init (PyTorch-style uniform fan-in bound)
    fan1 = 6 * 4 * 4
    w1 = jax.random.uniform(k1, (64, 6, 4, 4), jnp.float32,
                            -1.0 / np.sqrt(fan1), 1.0 / np.sqrt(fan1))
    b1 = jax.random.uniform(k2, (64,), jnp.float32,
                            -1.0 / np.sqrt(fan1), 1.0 / np.sqrt(fan1))
    fan2 = 64 * 4 * 4
    w2 = jax.random.uniform(k3, (1, 64, 4, 4), jnp.float32,
                            -1.0 / np.sqrt(fan2), 1.0 / np.sqrt(fan2))
    b2 = jax.random.uniform(k4, (1,), jnp.float32,
                            -1.0 / np.sqrt(fan2), 1.0 / np.sqrt(fan2))
    params = (w1, b1, w2, b2)

    out = jax.jit(discriminator_forward)(x, y, params)
    out = jax.block_until_ready(out)

    assert out.shape == (N, 1, H // 4, W // 4), out.shape
    ref = _reference_forward(x, y, params)
    np.testing.assert_allclose(np.asarray(out), np.asarray(ref),
                               rtol=1e-5, atol=1e-5)
    print("KERNEL_OK")
</pallas_src>

<mosaic_0001>
module attributes {stable_mosaic.version = 11 : i64} {
  func.func @_fused_disc_kernel(%arg0: i32, %arg1: memref<256x128xf32, #tpu.memory_space<vmem>>, %arg2: memref<128x64xf32, #tpu.memory_space<vmem>>, %arg3: memref<1x64xf32, #tpu.memory_space<vmem>>, %arg4: memref<16x64xf32, #tpu.memory_space<vmem>>, %arg5: memref<1x1xf32, #tpu.memory_space<vmem>>, %arg6: memref<1x8x8xf32, #tpu.memory_space<vmem>>, %arg7: memref<1x9x9x64xf32, #tpu.memory_space<vmem>>, %arg8: memref<1x9x9x64xf32, #tpu.memory_space<vmem>>, %arg9: memref<1x9x9x64xf32, #tpu.memory_space<vmem>>, %arg10: memref<1x9x9x64xf32, #tpu.memory_space<vmem>>) attributes {dimension_semantics = [#tpu.dimension_semantics<parallel>], iteration_bounds = array<i64: 2>, scalar_prefetch = 0 : i64, scratch_operands = 4 : i64, tpu.core_type = #tpu.core_type<tc>, window_params = [{transform_indices = @transform_0, window_bounds = array<i64: 256, 128>}, {pipeline_mode = #tpu.pipeline_mode<synchronous>, transform_indices = @transform_1, window_bounds = array<i64: 128, 64>}, {pipeline_mode = #tpu.pipeline_mode<synchronous>, transform_indices = @transform_2, window_bounds = array<i64: 1, 64>}, {pipeline_mode = #tpu.pipeline_mode<synchronous>, transform_indices = @transform_3, window_bounds = array<i64: 16, 64>}, {pipeline_mode = #tpu.pipeline_mode<synchronous>, transform_indices = @transform_4, window_bounds = array<i64: 1, 1>}, {transform_indices = @transform_5, window_bounds = array<i64: 1, 8, 8>}]} {
    %c0 = arith.constant 0 : index
    %c0_0 = arith.constant 0 : index
    %0 = vector.load %arg1[%c0, %c0_0] : memref<256x128xf32, #tpu.memory_space<vmem>>, vector<256x128xf32>
    %c0_1 = arith.constant 0 : index
    %c0_2 = arith.constant 0 : index
    %1 = vector.load %arg2[%c0_1, %c0_2] : memref<128x64xf32, #tpu.memory_space<vmem>>, vector<128x64xf32>
    %cst = arith.constant dense<0.000000e+00> : vector<256x64xf32>
    %2 = tpu.matmul %0, %1, %cst {dimension_numbers = #tpu.dot_dimension_numbers<[1], [0], [0], [1], [0, 0, 1, 1], [], []>} : vector<256x128xf32>, vector<128x64xf32>, vector<256x64xf32> -> vector<256x64xf32>
    %c0_3 = arith.constant 0 : index
    %c0_4 = arith.constant 0 : index
    %3 = vector.load %arg3[%c0_3, %c0_4] : memref<1x64xf32, #tpu.memory_space<vmem>>, vector<1x64xf32>
    %4 = vector.broadcast %3 : vector<1x64xf32> to vector<256x64xf32>
    %5 = arith.addf %2, %4 : vector<256x64xf32>
    %cst_5 = arith.constant 0.000000e+00 : f32
    %6 = vector.broadcast %cst_5 : f32 to vector<256x64xf32>
    %7 = arith.cmpf oge, %5, %6 : vector<256x64xf32>
    %cst_6 = arith.constant 2.000000e-01 : f32
    %8 = vector.broadcast %cst_6 : f32 to vector<256x64xf32>
    %9 = arith.mulf %8, %5 : vector<256x64xf32>
    %10 = arith.select %7, %5, %9 : vector<256x64xi1>, vector<256x64xf32>
    %11 = vector.shape_cast %10 : vector<256x64xf32> to vector<1x4x8x8x64xf32>
    %cst_7 = arith.constant 0.000000e+00 : f32
    %12 = vector.broadcast %cst_7 : f32 to vector<1x9x9x64xf32>
    %c0_8 = arith.constant 0 : index
    %c0_9 = arith.constant 0 : index
    %c0_10 = arith.constant 0 : index
    %c0_11 = arith.constant 0 : index
    %13 = vector.load %arg7[%c0_8, %c0_9, %c0_10, %c0_11] : memref<1x9x9x64xf32, #tpu.memory_space<vmem>>, vector<1x9x9x64xf32>
    tpu.vector_store %arg7[%c0_8, %c0_9, %c0_10, %c0_11], %12 {strides = array<i32>} : memref<1x9x9x64xf32, #tpu.memory_space<vmem>>, vector<1x9x9x64xf32>,
    %cst_12 = arith.constant 0.000000e+00 : f32
    %14 = vector.broadcast %cst_12 : f32 to vector<1x9x9x64xf32>
    %c0_13 = arith.constant 0 : index
    %c0_14 = arith.constant 0 : index
    %c0_15 = arith.constant 0 : index
    %c0_16 = arith.constant 0 : index
    %15 = vector.load %arg8[%c0_13, %c0_14, %c0_15, %c0_16] : memref<1x9x9x64xf32, #tpu.memory_space<vmem>>, vector<1x9x9x64xf32>
    tpu.vector_store %arg8[%c0_13, %c0_14, %c0_15, %c0_16], %14 {strides = array<i32>} : memref<1x9x9x64xf32, #tpu.memory_space<vmem>>, vector<1x9x9x64xf32>,
    %cst_17 = arith.constant 0.000000e+00 : f32
    %16 = vector.broadcast %cst_17 : f32 to vector<1x9x9x64xf32>
    %c0_18 = arith.constant 0 : index
    %c0_19 = arith.constant 0 : index
    %c0_20 = arith.constant 0 : index
    %c0_21 = arith.constant 0 : index
    %17 = vector.load %arg9[%c0_18, %c0_19, %c0_20, %c0_21] : memref<1x9x9x64xf32, #tpu.memory_space<vmem>>, vector<1x9x9x64xf32>
    tpu.vector_store %arg9[%c0_18, %c0_19, %c0_20, %c0_21], %16 {strides = array<i32>} : memref<1x9x9x64xf32, #tpu.memory_space<vmem>>, vector<1x9x9x64xf32>,
    %cst_22 = arith.constant 0.000000e+00 : f32
    %18 = vector.broadcast %cst_22 : f32 to vector<1x9x9x64xf32>
    %c0_23 = arith.constant 0 : index
    %c0_24 = arith.constant 0 : index
    %c0_25 = arith.constant 0 : index
    %c0_26 = arith.constant 0 : index
    %19 = vector.load %arg10[%c0_23, %c0_24, %c0_25, %c0_26] : memref<1x9x9x64xf32, #tpu.memory_space<vmem>>, vector<1x9x9x64xf32>
    tpu.vector_store %arg10[%c0_23, %c0_24, %c0_25, %c0_26], %18 {strides = array<i32>} : memref<1x9x9x64xf32, #tpu.memory_space<vmem>>, vector<1x9x9x64xf32>,
    %20 = vector.extract_strided_slice %11 {offsets = [0, 3, 0, 0, 0], sizes = [1, 1, 8, 8, 64], strides = [1, 1, 1, 1, 1]} : vector<1x4x8x8x64xf32> to vector<1x1x8x8x64xf32>
    %21 = vector.shape_cast %20 : vector<1x1x8x8x64xf32> to vector<1x8x8x64xf32>
    %c0_27 = arith.constant 0 : index
    %c1 = arith.constant 1 : index
    %c1_28 = arith.constant 1 : index
    %c0_29 = arith.constant 0 : index
    %22 = vector.load %arg7[%c0_27, %c1, %c1_28, %c0_29] : memref<1x9x9x64xf32, #tpu.memory_space<vmem>>, vector<1x8x8x64xf32>
    tpu.vector_store %arg7[%c0_27, %c1, %c1_28, %c0_29], %21 {strides = array<i32>} : memref<1x9x9x64xf32, #tpu.memory_space<vmem>>, vector<1x8x8x64xf32>,
    %23 = vector.extract_strided_slice %11 {offsets = [0, 2, 0, 0, 0], sizes = [1, 1, 8, 8, 64], strides = [1, 1, 1, 1, 1]} : vector<1x4x8x8x64xf32> to vector<1x1x8x8x64xf32>
    %24 = vector.shape_cast %23 : vector<1x1x8x8x64xf32> to vector<1x8x8x64xf32>
    %c0_30 = arith.constant 0 : index
    %c1_31 = arith.constant 1 : index
    %c0_32 = arith.constant 0 : index
    %c0_33 = arith.constant 0 : index
    %25 = vector.load %arg8[%c0_30, %c1_31, %c0_32, %c0_33] : memref<1x9x9x64xf32, #tpu.memory_space<vmem>>, vector<1x8x8x64xf32>
    tpu.vector_store %arg8[%c0_30, %c1_31, %c0_32, %c0_33], %24 {strides = array<i32>} : memref<1x9x9x64xf32, #tpu.memory_space<vmem>>, vector<1x8x8x64xf32>,
    %26 = vector.extract_strided_slice %11 {offsets = [0, 1, 0, 0, 0], sizes = [1, 1, 8, 8, 64], strides = [1, 1, 1, 1, 1]} : vector<1x4x8x8x64xf32> to vector<1x1x8x8x64xf32>
    %27 = vector.shape_cast %26 : vector<1x1x8x8x64xf32> to vector<1x8x8x64xf32>
    %c0_34 = arith.constant 0 : index
    %c0_35 = arith.constant 0 : index
    %c1_36 = arith.constant 1 : index
    %c0_37 = arith.constant 0 : index
    %28 = vector.load %arg9[%c0_34, %c0_35, %c1_36, %c0_37] : memref<1x9x9x64xf32, #tpu.memory_space<vmem>>, vector<1x8x8x64xf32>
    tpu.vector_store %arg9[%c0_34, %c0_35, %c1_36, %c0_37], %27 {strides = array<i32>} : memref<1x9x9x64xf32, #tpu.memory_space<vmem>>, vector<1x8x8x64xf32>,
    %29 = vector.extract_strided_slice %11 {offsets = [0, 0, 0, 0, 0], sizes = [1, 1, 8, 8, 64], strides = [1, 1, 1, 1, 1]} : vector<1x4x8x8x64xf32> to vector<1x1x8x8x64xf32>
    %30 = vector.shape_cast %29 : vector<1x1x8x8x64xf32> to vector<1x8x8x64xf32>
    %c0_38 = arith.constant 0 : index
    %c0_39 = arith.constant 0 : index
    %c0_40 = arith.constant 0 : index
    %c0_41 = arith.constant 0 : index
    %31 = vector.load %arg10[%c0_38, %c0_39, %c0_40, %c0_41] : memref<1x9x9x64xf32, #tpu.memory_space<vmem>>, vector<1x8x8x64xf32>
    tpu.vector_store %arg10[%c0_38, %c0_39, %c0_40, %c0_41], %30 {strides = array<i32>} : memref<1x9x9x64xf32, #tpu.memory_space<vmem>>, vector<1x8x8x64xf32>,
    %c0_42 = arith.constant 0 : index
    %c0_43 = arith.constant 0 : index
    %32 = vector.load %arg4[%c0_42, %c0_43] : memref<16x64xf32, #tpu.memory_space<vmem>>, vector<16x64xf32>
    %cst_44 = arith.constant 0.000000e+00 : f32
    %33 = vector.broadcast %cst_44 : f32 to vector<1x8x8x64xf32>
    %c0_45 = arith.constant 0 : index
    %c0_46 = arith.constant 0 : index
    %c0_47 = arith.constant 0 : index
    %c0_48 = arith.constant 0 : index
    %34 = vector.load %arg7[%c0_45, %c0_46, %c0_47, %c0_48] : memref<1x9x9x64xf32, #tpu.memory_space<vmem>>, vector<1x8x8x64xf32>
    %35 = vector.extract_strided_slice %32 {offsets = [0, 0], sizes = [1, 64], strides = [1, 1]} : vector<16x64xf32> to vector<1x64xf32>
    %36 = vector.shape_cast %35 : vector<1x64xf32> to vector<64xf32>
    %37 = vector.shape_cast %36 : vector<64xf32> to vector<1x1x1x64xf32>
    %38 = vector.broadcast %37 : vector<1x1x1x64xf32> to vector<1x8x8x64xf32>
    %39 = arith.mulf %34, %38 : vector<1x8x8x64xf32>
    %40 = arith.addf %33, %39 : vector<1x8x8x64xf32>
    %c0_49 = arith.constant 0 : index
    %c0_50 = arith.constant 0 : index
    %c0_51 = arith.constant 0 : index
    %c0_52 = arith.constant 0 : index
    %41 = vector.load %arg8[%c0_49, %c0_50, %c0_51, %c0_52] : memref<1x9x9x64xf32, #tpu.memory_space<vmem>>, vector<1x8x8x64xf32>
    %42 = vector.extract_strided_slice %32 {offsets = [1, 0], sizes = [1, 64], strides = [1, 1]} : vector<16x64xf32> to vector<1x64xf32>
    %43 = vector.shape_cast %42 : vector<1x64xf32> to vector<64xf32>
    %44 = vector.shape_cast %43 : vector<64xf32> to vector<1x1x1x64xf32>
    %45 = vector.broadcast %44 : vector<1x1x1x64xf32> to vector<1x8x8x64xf32>
    %46 = arith.mulf %41, %45 : vector<1x8x8x64xf32>
    %47 = arith.addf %40, %46 : vector<1x8x8x64xf32>
    %c0_53 = arith.constant 0 : index
    %c0_54 = arith.constant 0 : index
    %c1_55 = arith.constant 1 : index
    %c0_56 = arith.constant 0 : index
    %48 = vector.load %arg7[%c0_53, %c0_54, %c1_55, %c0_56] : memref<1x9x9x64xf32, #tpu.memory_space<vmem>>, vector<1x8x8x64xf32>
    %49 = vector.extract_strided_slice %32 {offsets = [2, 0], sizes = [1, 64], strides = [1, 1]} : vector<16x64xf32> to vector<1x64xf32>
    %50 = vector.shape_cast %49 : vector<1x64xf32> to vector<64xf32>
    %51 = vector.shape_cast %50 : vector<64xf32> to vector<1x1x1x64xf32>
    %52 = vector.broadcast %51 : vector<1x1x1x64xf32> to vector<1x8x8x64xf32>
    %53 = arith.mulf %48, %52 : vector<1x8x8x64xf32>
    %54 = arith.addf %47, %53 : vector<1x8x8x64xf32>
    %c0_57 = arith.constant 0 : index
    %c0_58 = arith.constant 0 : index
    %c1_59 = arith.constant 1 : index
    %c0_60 = arith.constant 0 : index
    %55 = vector.load %arg8[%c0_57, %c0_58, %c1_59, %c0_60] : memref<1x9x9x64xf32, #tpu.memory_space<vmem>>, vector<1x8x8x64xf32>
    %56 = vector.extract_strided_slice %32 {offsets = [3, 0], sizes = [1, 64], strides = [1, 1]} : vector<16x64xf32> to vector<1x64xf32>
    %57 = vector.shape_cast %56 : vector<1x64xf32> to vector<64xf32>
    %58 = vector.shape_cast %57 : vector<64xf32> to vector<1x1x1x64xf32>
    %59 = vector.broadcast %58 : vector<1x1x1x64xf32> to vector<1x8x8x64xf32>
    %60 = arith.mulf %55, %59 : vector<1x8x8x64xf32>
    %61 = arith.addf %54, %60 : vector<1x8x8x64xf32>
    %c0_61 = arith.constant 0 : index
    %c0_62 = arith.constant 0 : index
    %c0_63 = arith.constant 0 : index
    %c0_64 = arith.constant 0 : index
    %62 = vector.load %arg9[%c0_61, %c0_62, %c0_63, %c0_64] : memref<1x9x9x64xf32, #tpu.memory_space<vmem>>, vector<1x8x8x64xf32>
    %63 = vector.extract_strided_slice %32 {offsets = [4, 0], sizes = [1, 64], strides = [1, 1]} : vector<16x64xf32> to vector<1x64xf32>
    %64 = vector.shape_cast %63 : vector<1x64xf32> to vector<64xf32>
    %65 = vector.shape_cast %64 : vector<64xf32> to vector<1x1x1x64xf32>
    %66 = vector.broadcast %65 : vector<1x1x1x64xf32> to vector<1x8x8x64xf32>
    %67 = arith.mulf %62, %66 : vector<1x8x8x64xf32>
    %68 = arith.addf %61, %67 : vector<1x8x8x64xf32>
    %c0_65 = arith.constant 0 : index
    %c0_66 = arith.constant 0 : index
    %c0_67 = arith.constant 0 : index
    %c0_68 = arith.constant 0 : index
    %69 = vector.load %arg10[%c0_65, %c0_66, %c0_67, %c0_68] : memref<1x9x9x64xf32, #tpu.memory_space<vmem>>, vector<1x8x8x64xf32>
    %70 = vector.extract_strided_slice %32 {offsets = [5, 0], sizes = [1, 64], strides = [1, 1]} : vector<16x64xf32> to vector<1x64xf32>
    %71 = vector.shape_cast %70 : vector<1x64xf32> to vector<64xf32>
    %72 = vector.shape_cast %71 : vector<64xf32> to vector<1x1x1x64xf32>
    %73 = vector.broadcast %72 : vector<1x1x1x64xf32> to vector<1x8x8x64xf32>
    %74 = arith.mulf %69, %73 : vector<1x8x8x64xf32>
    %75 = arith.addf %68, %74 : vector<1x8x8x64xf32>
    %c0_69 = arith.constant 0 : index
    %c0_70 = arith.constant 0 : index
    %c1_71 = arith.constant 1 : index
    %c0_72 = arith.constant 0 : index
    %76 = vector.load %arg9[%c0_69, %c0_70, %c1_71, %c0_72] : memref<1x9x9x64xf32, #tpu.memory_space<vmem>>, vector<1x8x8x64xf32>
    %77 = vector.extract_strided_slice %32 {offsets = [6, 0], sizes = [1, 64], strides = [1, 1]} : vector<16x64xf32> to vector<1x64xf32>
    %78 = vector.shape_cast %77 : vector<1x64xf32> to vector<64xf32>
    %79 = vector.shape_cast %78 : vector<64xf32> to vector<1x1x1x64xf32>
    %80 = vector.broadcast %79 : vector<1x1x1x64xf32> to vector<1x8x8x64xf32>
    %81 = arith.mulf %76, %80 : vector<1x8x8x64xf32>
    %82 = arith.addf %75, %81 : vector<1x8x8x64xf32>
    %c0_73 = arith.constant 0 : index
    %c0_74 = arith.constant 0 : index
    %c1_75 = arith.constant 1 : index
    %c0_76 = arith.constant 0 : index
    %83 = vector.load %arg10[%c0_73, %c0_74, %c1_75, %c0_76] : memref<1x9x9x64xf32, #tpu.memory_space<vmem>>, vector<1x8x8x64xf32>
    %84 = vector.extract_strided_slice %32 {offsets = [7, 0], sizes = [1, 64], strides = [1, 1]} : vector<16x64xf32> to vector<1x64xf32>
    %85 = vector.shape_cast %84 : vector<1x64xf32> to vector<64xf32>
    %86 = vector.shape_cast %85 : vector<64xf32> to vector<1x1x1x64xf32>
    %87 = vector.broadcast %86 : vector<1x1x1x64xf32> to vector<1x8x8x64xf32>
    %88 = arith.mulf %83, %87 : vector<1x8x8x64xf32>
    %89 = arith.addf %82, %88 : vector<1x8x8x64xf32>
    %c0_77 = arith.constant 0 : index
    %c1_78 = arith.constant 1 : index
    %c0_79 = arith.constant 0 : index
    %c0_80 = arith.constant 0 : index
    %90 = vector.load %arg7[%c0_77, %c1_78, %c0_79, %c0_80] : memref<1x9x9x64xf32, #tpu.memory_space<vmem>>, vector<1x8x8x64xf32>
    %91 = vector.extract_strided_slice %32 {offsets = [8, 0], sizes = [1, 64], strides = [1, 1]} : vector<16x64xf32> to vector<1x64xf32>
    %92 = vector.shape_cast %91 : vector<1x64xf32> to vector<64xf32>
    %93 = vector.shape_cast %92 : vector<64xf32> to vector<1x1x1x64xf32>
    %94 = vector.broadcast %93 : vector<1x1x1x64xf32> to vector<1x8x8x64xf32>
    %95 = arith.mulf %90, %94 : vector<1x8x8x64xf32>
    %96 = arith.addf %89, %95 : vector<1x8x8x64xf32>
    %c0_81 = arith.constant 0 : index
    %c1_82 = arith.constant 1 : index
    %c0_83 = arith.constant 0 : index
    %c0_84 = arith.constant 0 : index
    %97 = vector.load %arg8[%c0_81, %c1_82, %c0_83, %c0_84] : memref<1x9x9x64xf32, #tpu.memory_space<vmem>>, vector<1x8x8x64xf32>
    %98 = vector.extract_strided_slice %32 {offsets = [9, 0], sizes = [1, 64], strides = [1, 1]} : vector<16x64xf32> to vector<1x64xf32>
    %99 = vector.shape_cast %98 : vector<1x64xf32> to vector<64xf32>
    %100 = vector.shape_cast %99 : vector<64xf32> to vector<1x1x1x64xf32>
    %101 = vector.broadcast %100 : vector<1x1x1x64xf32> to vector<1x8x8x64xf32>
    %102 = arith.mulf %97, %101 : vector<1x8x8x64xf32>
    %103 = arith.addf %96, %102 : vector<1x8x8x64xf32>
    %c0_85 = arith.constant 0 : index
    %c1_86 = arith.constant 1 : index
    %c1_87 = arith.constant 1 : index
    %c0_88 = arith.constant 0 : index
    %104 = vector.load %arg7[%c0_85, %c1_86, %c1_87, %c0_88] : memref<1x9x9x64xf32, #tpu.memory_space<vmem>>, vector<1x8x8x64xf32>
    %105 = vector.extract_strided_slice %32 {offsets = [10, 0], sizes = [1, 64], strides = [1, 1]} : vector<16x64xf32> to vector<1x64xf32>
    %106 = vector.shape_cast %105 : vector<1x64xf32> to vector<64xf32>
    %107 = vector.shape_cast %106 : vector<64xf32> to vector<1x1x1x64xf32>
    %108 = vector.broadcast %107 : vector<1x1x1x64xf32> to vector<1x8x8x64xf32>
    %109 = arith.mulf %104, %108 : vector<1x8x8x64xf32>
    %110 = arith.addf %103, %109 : vector<1x8x8x64xf32>
    %c0_89 = arith.constant 0 : index
    %c1_90 = arith.constant 1 : index
    %c1_91 = arith.constant 1 : index
    %c0_92 = arith.constant 0 : index
    %111 = vector.load %arg8[%c0_89, %c1_90, %c1_91, %c0_92] : memref<1x9x9x64xf32, #tpu.memory_space<vmem>>, vector<1x8x8x64xf32>
    %112 = vector.extract_strided_slice %32 {offsets = [11, 0], sizes = [1, 64], strides = [1, 1]} : vector<16x64xf32> to vector<1x64xf32>
    %113 = vector.shape_cast %112 : vector<1x64xf32> to vector<64xf32>
    %114 = vector.shape_cast %113 : vector<64xf32> to vector<1x1x1x64xf32>
    %115 = vector.broadcast %114 : vector<1x1x1x64xf32> to vector<1x8x8x64xf32>
    %116 = arith.mulf %111, %115 : vector<1x8x8x64xf32>
    %117 = arith.addf %110, %116 : vector<1x8x8x64xf32>
    %c0_93 = arith.constant 0 : index
    %c1_94 = arith.constant 1 : index
    %c0_95 = arith.constant 0 : index
    %c0_96 = arith.constant 0 : index
    %118 = vector.load %arg9[%c0_93, %c1_94, %c0_95, %c0_96] : memref<1x9x9x64xf32, #tpu.memory_space<vmem>>, vector<1x8x8x64xf32>
    %119 = vector.extract_strided_slice %32 {offsets = [12, 0], sizes = [1, 64], strides = [1, 1]} : vector<16x64xf32> to vector<1x64xf32>
    %120 = vector.shape_cast %119 : vector<1x64xf32> to vector<64xf32>
    %121 = vector.shape_cast %120 : vector<64xf32> to vector<1x1x1x64xf32>
    %122 = vector.broadcast %121 : vector<1x1x1x64xf32> to vector<1x8x8x64xf32>
    %123 = arith.mulf %118, %122 : vector<1x8x8x64xf32>
    %124 = arith.addf %117, %123 : vector<1x8x8x64xf32>
    %c0_97 = arith.constant 0 : index
    %c1_98 = arith.constant 1 : index
    %c0_99 = arith.constant 0 : index
    %c0_100 = arith.constant 0 : index
    %125 = vector.load %arg10[%c0_97, %c1_98, %c0_99, %c0_100] : memref<1x9x9x64xf32, #tpu.memory_space<vmem>>, vector<1x8x8x64xf32>
    %126 = vector.extract_strided_slice %32 {offsets = [13, 0], sizes = [1, 64], strides = [1, 1]} : vector<16x64xf32> to vector<1x64xf32>
    %127 = vector.shape_cast %126 : vector<1x64xf32> to vector<64xf32>
    %128 = vector.shape_cast %127 : vector<64xf32> to vector<1x1x1x64xf32>
    %129 = vector.broadcast %128 : vector<1x1x1x64xf32> to vector<1x8x8x64xf32>
    %130 = arith.mulf %125, %129 : vector<1x8x8x64xf32>
    %131 = arith.addf %124, %130 : vector<1x8x8x64xf32>
    %c0_101 = arith.constant 0 : index
    %c1_102 = arith.constant 1 : index
    %c1_103 = arith.constant 1 : index
    %c0_104 = arith.constant 0 : index
    %132 = vector.load %arg9[%c0_101, %c1_102, %c1_103, %c0_104] : memref<1x9x9x64xf32, #tpu.memory_space<vmem>>, vector<1x8x8x64xf32>
    %133 = vector.extract_strided_slice %32 {offsets = [14, 0], sizes = [1, 64], strides = [1, 1]} : vector<16x64xf32> to vector<1x64xf32>
    %134 = vector.shape_cast %133 : vector<1x64xf32> to vector<64xf32>
    %135 = vector.shape_cast %134 : vector<64xf32> to vector<1x1x1x64xf32>
    %136 = vector.broadcast %135 : vector<1x1x1x64xf32> to vector<1x8x8x64xf32>
    %137 = arith.mulf %132, %136 : vector<1x8x8x64xf32>
    %138 = arith.addf %131, %137 : vector<1x8x8x64xf32>
    %c0_105 = arith.constant 0 : index
    %c1_106 = arith.constant 1 : index
    %c1_107 = arith.constant 1 : index
    %c0_108 = arith.constant 0 : index
    %139 = vector.load %arg10[%c0_105, %c1_106, %c1_107, %c0_108] : memref<1x9x9x64xf32, #tpu.memory_space<vmem>>, vector<1x8x8x64xf32>
    %140 = vector.extract_strided_slice %32 {offsets = [15, 0], sizes = [1, 64], strides = [1, 1]} : vector<16x64xf32> to vector<1x64xf32>
    %141 = vector.shape_cast %140 : vector<1x64xf32> to vector<64xf32>
    %142 = vector.shape_cast %141 : vector<64xf32> to vector<1x1x1x64xf32>
    %143 = vector.broadcast %142 : vector<1x1x1x64xf32> to vector<1x8x8x64xf32>
    %144 = arith.mulf %139, %143 : vector<1x8x8x64xf32>
    %145 = arith.addf %138, %144 : vector<1x8x8x64xf32>
    %cst_109 = arith.constant dense<0.000000e+00> : vector<1x8x8xf32>
    %146 = vector.multi_reduction <add>, %145, %cst_109 [3] : vector<1x8x8x64xf32> to vector<1x8x8xf32>
    %c0_110 = arith.constant 0 : index
    %c0_111 = arith.constant 0 : index
    %147 = vector.load %arg5[%c0_110, %c0_111] : memref<1x1xf32, #tpu.memory_space<vmem>>, vector<1x1xf32>
    %148 = vector.shape_cast %147 : vector<1x1xf32> to vector<1x1x1xf32>
    %149 = vector.broadcast %148 : vector<1x1x1xf32> to vector<1x8x8xf32>
    %150 = arith.addf %146, %149 : vector<1x8x8xf32>
    %cst_112 = arith.constant 0.000000e+00 : f32
    %151 = vector.broadcast %cst_112 : f32 to vector<1x8x8xf32>
    %152 = arith.subf %151, %150 : vector<1x8x8xf32>
    %153 = math.exp %152 : vector<1x8x8xf32>
    %cst_113 = arith.constant 1.000000e+00 : f32
    %154 = vector.broadcast %cst_113 : f32 to vector<1x8x8xf32>
    %155 = arith.addf %154, %153 : vector<1x8x8xf32>
    %cst_114 = arith.constant 1.000000e+00 : f32
    %156 = vector.broadcast %cst_114 : f32 to vector<1x8x8xf32>
    %157 = arith.divf %156, %155 : vector<1x8x8xf32>
    %c0_115 = arith.constant 0 : index
    %c0_116 = arith.constant 0 : index
    %c0_117 = arith.constant 0 : index
    %158 = vector.load %arg6[%c0_115, %c0_116, %c0_117] : memref<1x8x8xf32, #tpu.memory_space<vmem>>, vector<1x8x8xf32>
    tpu.vector_store %arg6[%c0_115, %c0_116, %c0_117], %157 {strides = array<i32>} : memref<1x8x8xf32, #tpu.memory_space<vmem>>, vector<1x8x8xf32>,
    return
  }
  func.func @transform_0(%arg0: i32) -> (i32, i32) {
    %c0_i32 = arith.constant 0 : i32
    %c0_i32_0 = arith.constant 0 : i32
    return %arg0, %c0_i32 : i32, i32
  }
  func.func @transform_1(%arg0: i32) -> (i32, i32) {
    %c0_i32 = arith.constant 0 : i32
    %c0_i32_0 = arith.constant 0 : i32
    %c0_i32_1 = arith.constant 0 : i32
    return %c0_i32, %c0_i32_0 : i32, i32
  }
  func.func @transform_2(%arg0: i32) -> (i32, i32) {
    %c0_i32 = arith.constant 0 : i32
    %c0_i32_0 = arith.constant 0 : i32
    %c0_i32_1 = arith.constant 0 : i32
    return %c0_i32, %c0_i32_0 : i32, i32
  }
  func.func @transform_3(%arg0: i32) -> (i32, i32) {
    %c0_i32 = arith.constant 0 : i32
    %c0_i32_0 = arith.constant 0 : i32
    %c0_i32_1 = arith.constant 0 : i32
    return %c0_i32, %c0_i32_0 : i32, i32
  }
  func.func @transform_4(%arg0: i32) -> (i32, i32) {
    %c0_i32 = arith.constant 0 : i32
    %c0_i32_0 = arith.constant 0 : i32
    %c0_i32_1 = arith.constant 0 : i32
    return %c0_i32, %c0_i32_0 : i32, i32
  }
  func.func @transform_5(%arg0: i32) -> (i32, i32, i32) {
    %c0_i32 = arith.constant 0 : i32
    %c0_i32_0 = arith.constant 0 : i32
    %c0_i32_1 = arith.constant 0 : i32
    return %arg0, %c0_i32, %c0_i32_0 : i32, i32, i32
  }
}

</mosaic_0001>

<bundles_post_ra>
// kernel: discriminator_forward.1
= control target key start
LH: loop header
LB: loop body
LE: loop exit
PB: predicated region body
PF: predicated region fallthrough
CT: control target
= control target key end

     0   :  { %s2419_s0 = inlined_call_operand.vmem [shape: f32[512,128], index: 0, kind: input, shape index: {}]   ;;  %s2420_s1 = inlined_call_operand.vmem [shape: f32[128,64], index: 1, kind: input, shape index: {}]   ;;  %s2421_s2 = inlined_call_operand.vmem [shape: f32[1,64], index: 2, kind: input, shape index: {}]   ;;  %s2422_s3 = inlined_call_operand.vmem [shape: f32[16,64], index: 3, kind: input, shape index: {}]   ;;  %s2423_s4 = inlined_call_operand.<no memory space> [shape: f32[1,1], index: 4, kind: input, shape index: {}]   ;;  %s2424_s5 = inlined_call_operand.hbm [shape: f32[2,8,8], index: 5, kind: output, shape index: {}]  }
   0x1   :  { %v10_v0 = vstv %s2423_s4 }
   0x2   :  { %11 = vst [vmem:[#allocation6] sm:$0x1] %v10_v0 }
   0x3   :  { %12 = vsyncpa [#allocation8], 0 }
   0x4   :  { %14 = vsyncpa [#allocation8 + $0x1], 0  ;;  %s1748_s20 = smov 0   ;;  %s1750_s21 = smov 0  }
   0x5   :  { %s1752_s22 = smov 0   ;;  %s1754_s23 = smov 0  }
   0x6 LB: > { %s1769_s4 = sadd.s32 4294967295, %s1710_s23   ;;  %s1385_s24 = sadd.s32 4294967294, %s1710_s23   ;;  %s1710_s23 = sphi %s1754_s23, %s2432_s23   ;;  %s1706_s22 = sphi %s1752_s22, %s2431_s22   ;;  %s1702_s21 = sphi %s1750_s21, %s2430_s21   ;;  %s1698_s20 = sphi %s1748_s20, %s2429_s20  }
   0x7   : > { %s1773_s25 = sadd.s32 1, %s1710_s23   ;;  %s137_s26 = sadd.s32 1, %s1706_s22 }
   0x8   : > { %s134_s27 = ssub.s32 %s1710_s23, %s1773_s25  ;;  %p147_p0 = scmp.ne.s32.totalorder %s1706_s22, %s1702_s21 }
   0x9   : > { %p135_p1 = scmp.eq.s32.totalorder %s134_s27, 0  ;;  %p148_p2 = scmp.eq.s32.totalorder %s1769_s4, 1 }
   0xa   : > { %p153_p3 = scmp.ne.s32.totalorder %s1702_s21, %s1698_s20  ;;  %p154_p4 = scmp.eq.s32.totalorder %s1385_s24, 1 }
   0xb   : > { %s1784_s28 = scalar_select %p135_p1, %s1706_s22, %s137_s26  }
   0xc   : > { %p1786_p5 = por %p148_p2, %p147_p0  ;;  %p1790_p6 = por %p154_p4, %p153_p3 }
   0xd   : > { %p1388_p7 = scmp.ge.s32.totalorder %s1710_s23, 1  ;;  %p193_p8 = scmp.lt.s32.totalorder %s1710_s23, 3 }
   0xf   : > { %p194_p9 = pnand %p1388_p7, %p193_p8 }
  0x10   : > { %v259_v1 = vld [vmem:[%s2420_s1] sm:$0xff] (!%p194_p9)  ;;  %v260_v2 = vld [vmem:[%s2420_s1 + $0x8] sm:$0xff] (!%p194_p9)  ;;  %v261_v3 = vld [vmem:[%s2420_s1 + $0x10] sm:$0xff] (!%p194_p9)  ;;  %s1390_s12 = sshll.u32 (!%p194_p9), %s1769_s4, 5  ;;  %vm603_vm0 = vcmask (!%p194_p9), 523264   ;;  %v1712_v57 = vmov (!%p194_p9), 0.0   ;;  %v2425_v58 = vlaneseq (!%p194_p9) }
  0x11   : > { %197 = sbr.rel (%p194_p9) target bundleno = 574 (0x23e), region = 40  ;;  %v1526_v4 = vpack.c.bf16 (!%p194_p9), %v260_v2, %v259_v1  ;;  %v262_v5 = vld [vmem:[%s2420_s1 + $0x18] sm:$0xff] (!%p194_p9)  ;;  %p222_p10 = scmp.lt.s32.totalorder (!%p194_p9), %s1390_s12, 63  ;;  %v263_v7 = vld [vmem:[%s2420_s1 + $0x20] sm:$0xff] (!%p194_p9)  ;;  %v264_v8 = vld [vmem:[%s2420_s1 + $0x28] sm:$0xff] (!%p194_p9)  ;;  %661 = vst.msk [vmem:[#allocation5 + $0x10] sm:$0xff] (!%p194_p9), %vm603_vm0, %v1712_v57 }
  0x12   : > { %v1530_v6 = vpack.c.bf16 (!%p194_p9), %v262_v5, %v261_v3  ;;  %v1534_v9 = vpack.c.bf16 (!%p194_p9), %v264_v8, %v263_v7  ;;  %v265_v10 = vld [vmem:[%s2420_s1 + $0x30] sm:$0xff] (!%p194_p9)  ;;  %v266_v11 = vld [vmem:[%s2420_s1 + $0x38] sm:$0xff] (!%p194_p9)  ;;  %v267_v15 = vld [vmem:[%s2420_s1 + $0x40] sm:$0xff] (!%p194_p9)  ;;  %604 = vst.msk [vmem:[#allocation2] sm:$0xff] (!%p194_p9), %vm603_vm0, %v1712_v57  ;;  %vm605_vm1 = vcmask (!%p194_p9), 516096   ;;  %v2027_v59 = vshrl.u32 (!%p194_p9), %v2425_v58, 7 }
  0x13   : > { %1527 = vmatprep.subr.bf16.mxu0 (!%p194_p9), %v1526_v4  ;;  %1558 = vmatprep.subr.bf16.mxu1 (!%p194_p9), %v1526_v4  ;;  %v1538_v14 = vpack.c.bf16 (!%p194_p9), %v266_v11, %v265_v10  ;;  %v268_v16 = vld [vmem:[%s2420_s1 + $0x48] sm:$0xff] (!%p194_p9)  ;;  %v269_v18 = vld [vmem:[%s2420_s1 + $0x50] sm:$0xff] (!%p194_p9)  ;;  %v270_v19 = vld [vmem:[%s2420_s1 + $0x58] sm:$0xff] (!%p194_p9)  ;;  %607 = vst.msk [vmem:[#allocation2 + $0x10] sm:$0xff] (!%p194_p9), %vm603_vm0, %v1712_v57  ;;  %v1713_v61 = vmov (!%p194_p9), 0   ;;  %s218_s15 = sand.u32 (!%p194_p9), 1, %s1702_s21  }
  0x14   : > { %1529 = vmatpush3.bf16.msra.mxu0 (!%p194_p9), %v1526_v4  ;;  %1566 = vmatpush3.bf16.msra.mxu1 (!%p194_p9), %v1526_v4  ;;  %v1542_v17 = vpack.c.bf16 (!%p194_p9), %v268_v16, %v267_v15  ;;  %v1546_v20 = vpack.c.bf16 (!%p194_p9), %v270_v19, %v269_v18  ;;  %v271_v21 = vld [vmem:[%s2420_s1 + $0x60] sm:$0xff] (!%p194_p9)  ;;  %v272_v22 = vld [vmem:[%s2420_s1 + $0x68] sm:$0xff] (!%p194_p9)  ;;  %v273_v24 = vld [vmem:[%s2420_s1 + $0x70] sm:$0xff] (!%p194_p9)  ;;  %609 = vst.msk [vmem:[#allocation2 + $0x20] sm:$0xff] (!%p194_p9), %vm603_vm0, %v1712_v57  ;;  %v723_v60 = vsub.s32 (!%p194_p9), 0, %v2027_v59  ;;  %v751_v62 = vsub.s32 (!%p194_p9), 1, %v2027_v59 }
  0x15   : > { %1531 = vmatprep.subr.bf16.mxu0 (!%p194_p9), %v1530_v6  ;;  %1559 = vmatprep.subr.bf16.mxu1 (!%p194_p9), %v1530_v6  ;;  %v1550_v23 = vpack.c.bf16 (!%p194_p9), %v272_v22, %v271_v21  ;;  %v274_v25 = vld [vmem:[%s2420_s1 + $0x78] sm:$0xff] (!%p194_p9)  ;;  %611 = vst.msk [vmem:[#allocation2 + $0x30] sm:$0xff] (!%p194_p9), %vm603_vm0, %v1712_v57  ;;  %613 = vst.msk [vmem:[#allocation2 + $0x40] sm:$0xff] (!%p194_p9), %vm603_vm0, %v1712_v57  ;;  %v2034_v63 = vld [vmem:[%s2422_s3] sm:$0xff] (!%p194_p9)  ;;  %v779_v1 = vsub.s32 (!%p194_p9), 2, %v2027_v59  ;;  %v807_v5 = vsub.s32 (!%p194_p9), 3, %v2027_v59 }
  0x16   : > { %v1554_v26 = vpack.c.bf16 (!%p194_p9), %v274_v25, %v273_v24  ;;  %615 = vst.msk [vmem:[#allocation2 + $0x50] sm:$0xff] (!%p194_p9), %vm603_vm0, %v1712_v57  ;;  %617 = vst.msk [vmem:[#allocation2 + $0x60] sm:$0xff] (!%p194_p9), %vm603_vm0, %v1712_v57  ;;  %1615 = vset.pattern.permute.xlu0 (!%p194_p9), %v1713_v61  ;;  %v2039_v0 = vrot.slane (!%p194_p9), %v2034_v63, %v723_v60  ;;  %v2045_v4 = vrot.slane (!%p194_p9), %v2034_v63, %v751_v62  ;;  %s2368_s16 = sshll.u32 (!%p194_p9), %s218_s15, 3  ;;  %s1395_s17 = sshll.u32 (!%p194_p9), %s1769_s4, 7 }
  0x17   : > { %619 = vst.msk [vmem:[#allocation2 + $0x70] sm:$0xff] (!%p194_p9), %vm603_vm0, %v1712_v57  ;;  %621 = vst.msk [vmem:[#allocation2 + $0x80] sm:$0xff] (!%p194_p9), %vm603_vm0, %v1712_v57  ;;  %v863_v18 = vsub.s32 (!%p194_p9), 5, %v2027_v59  ;;  %s220_s18 = scalar_lea.vmem (!%p194_p9), [#allocation7], %s2368_s16  ;;  %s2375_s27 = scalar_lea.hbm (!%p194_p9), %s2424_s5, %s1395_s17 }
  0x18   : > { %s2434_s12 = smov (!%p222_p10, %s1390_s12), 63  ;;  %1533 = vmatpush3.bf16.msra.mxu0 %v1530_v6  ;;  %1567 = vmatpush3.bf16.msra.mxu1 %v1530_v6  ;;  %623 = vst.msk [vmem:[#allocation3] sm:$0xff] %vm603_vm0, %v1712_v57  ;;  %625 = vst.msk [vmem:[#allocation3 + $0x10] sm:$0xff] %vm603_vm0, %v1712_v57  ;;  %v2051_v6 = vld [vmem:[%s2421_s2] ss:$0 sm:$0xff]  ;;  %s1313_s4 = scalar_lea.sflag [#allocation8], %s218_s15 }
  0x19   : > { %s1391_s19 = sshll.u32 %s2434_s12, 3  ;;  %1535 = vmatprep.subr.bf16.mxu0 %v1534_v9  ;;  %1560 = vmatprep.subr.bf16.mxu1 %v1534_v9  ;;  %627 = vst.msk [vmem:[#allocation3 + $0x20] sm:$0xff] %vm603_vm0, %v1712_v57  ;;  %629 = vst.msk [vmem:[#allocation3 + $0x30] sm:$0xff] %vm603_vm0, %v1712_v57  ;;  %v713_v2 = vld [vmem:[#allocation2] sm:$0xff]  ;;  %s1714_s7 = smov [#allocation7]  }
  0x1a   : > { %s1824_s9 = scalar_lea.vmem %s2419_s0, %s1391_s19  ;;  %631 = vst.msk [vmem:[#allocation3 + $0x40] sm:$0xff] %vm603_vm0, %v1712_v57  ;;  %633 = vst.msk [vmem:[#allocation3 + $0x50] sm:$0xff] %vm603_vm0, %v1712_v57  ;;  %v725_v7 = vmul.f32 %v2039_v0, %v713_v2  ;;  %s1326_s19 = sshll.u32 %s220_s18, 4  ;;  %s2377_s19 = int_to_ptr.vmem [resolvable:$true] %s1326_s19 }
  0x1b   : > { %v227_v12 = vld [vmem:[%s1824_s9] sm:$0xff]  ;;  %v228_v27 = vld [vmem:[%s1824_s9 + $0x8] sm:$0xff]  ;;  %v229_v29 = vld [vmem:[%s1824_s9 + $0x10] sm:$0xff]  ;;  %635 = vst.msk [vmem:[#allocation3 + $0x60] sm:$0xff] %vm603_vm0, %v1712_v57  ;;  %s1648_s6 = scalar_lea.vmem %s2377_s19, 128  ;;  %s1652_s8 = sshll.u32 %s1714_s7, 4  ;;  %s1653_s8 = int_to_ptr.vmem [resolvable:$false] %s1652_s8 }
  0x1c   : > { %v243_v13 = vld [vmem:[%s1824_s9 + $0x80] sm:$0xff]  ;;  %1478 = vmatprep.mubr.f32.mxu0 %v227_v12  ;;  %1537 = vmatpush3.bf16.msra.mxu0 %v1534_v9  ;;  %v244_v28 = vld [vmem:[%s1824_s9 + $0x88] sm:$0xff]  ;;  %v245_v30 = vld [vmem:[%s1824_s9 + $0x90] sm:$0xff]  ;;  %637 = vst.msk [vmem:[#allocation3 + $0x70] sm:$0xff] %vm603_vm0, %v1712_v57  ;;  %p1649_p11 = scmp.ne.s32.totalorder %s2377_s19, %s1648_s6  ;;  %p1655_p0 = scmp.lt.s32.totalorder %s2377_s19, %s1653_s8 }
  0x1d   : > { %1502 = vmatprep.mubr.f32.mxu1 %v243_v13  ;;  %1568 = vmatpush3.bf16.msra.mxu1 %v1534_v9  ;;  %v230_v31 = vld [vmem:[%s1824_s9 + $0x18] sm:$0xff]  ;;  %v231_v33 = vld [vmem:[%s1824_s9 + $0x20] sm:$0xff]  ;;  %v232_v35 = vld [vmem:[%s1824_s9 + $0x28] sm:$0xff]  ;;  %639 = vst.msk [vmem:[#allocation3 + $0x80] sm:$0xff] %vm603_vm0, %v1712_v57  ;;  %v2058_v9 = vrot.slane %v2034_v63, %v779_v1 }
  0x1e   : > { %1539 = vmatprep.subr.bf16.mxu0 %v1538_v14  ;;  %1561 = vmatprep.subr.bf16.mxu1 %v1538_v14  ;;  %v246_v32 = vld [vmem:[%s1824_s9 + $0x98] sm:$0xff]  ;;  %v247_v34 = vld [vmem:[%s1824_s9 + $0xa0] sm:$0xff]  ;;  %v248_v36 = vld [vmem:[%s1824_s9 + $0xa8] sm:$0xff]  ;;  %641 = vst.msk [vmem:[#allocation4] sm:$0xff] %vm603_vm0, %v1712_v57  ;;  %p1650_p12 = pnand %p1649_p11, %p1786_p5 }
  0x1f   : > { %v233_v37 = vld [vmem:[%s1824_s9 + $0x30] sm:$0xff]  ;;  %v234_v39 = vld [vmem:[%s1824_s9 + $0x38] sm:$0xff]  ;;  %v235_v41 = vld [vmem:[%s1824_s9 + $0x40] sm:$0xff]  ;;  %643 = vst.msk [vmem:[#allocation4 + $0x10] sm:$0xff] %vm603_vm0, %v1712_v57 }
  0x20   : > { %1541 = vmatpush3.bf16.msra.mxu0 %v1538_v14  ;;  %v249_v38 = vld [vmem:[%s1824_s9 + $0xb0] sm:$0xff]  ;;  %v250_v40 = vld [vmem:[%s1824_s9 + $0xb8] sm:$0xff]  ;;  %v251_v42 = vld [vmem:[%s1824_s9 + $0xc0] sm:$0xff]  ;;  %645 = vst.msk [vmem:[#allocation4 + $0x20] sm:$0xff] %vm603_vm0, %v1712_v57  ;;  %p1651_p13 = pneg %p1650_p12 }
  0x21   : > { %1569 = vmatpush3.bf16.msra.mxu1 %v1538_v14  ;;  %1543 = vmatprep.subr.bf16.mxu0 %v1542_v17  ;;  %v236_v43 = vld [vmem:[%s1824_s9 + $0x48] sm:$0xff]  ;;  %v237_v45 = vld [vmem:[%s1824_s9 + $0x50] sm:$0xff]  ;;  %v238_v47 = vld [vmem:[%s1824_s9 + $0x58] sm:$0xff]  ;;  %647 = vst.msk [vmem:[#allocation4 + $0x30] sm:$0xff] %vm603_vm0, %v1712_v57 }
  0x22   : > { %1562 = vmatprep.subr.bf16.mxu1 %v1542_v17  ;;  %v252_v44 = vld [vmem:[%s1824_s9 + $0xc8] sm:$0xff]  ;;  %v253_v46 = vld [vmem:[%s1824_s9 + $0xd0] sm:$0xff]  ;;  %v254_v48 = vld [vmem:[%s1824_s9 + $0xd8] sm:$0xff]  ;;  %649 = vst.msk [vmem:[#allocation4 + $0x40] sm:$0xff] %vm603_vm0, %v1712_v57 }
  0x23   : > { %v239_v49 = vld [vmem:[%s1824_s9 + $0x60] sm:$0xff]  ;;  %v240_v51 = vld [vmem:[%s1824_s9 + $0x68] sm:$0xff]  ;;  %v241_v53 = vld [vmem:[%s1824_s9 + $0x70] sm:$0xff]  ;;  %651 = vst.msk [vmem:[#allocation4 + $0x50] sm:$0xff] %vm603_vm0, %v1712_v57 }
  0x24   : > { %1545 = vmatpush3.bf16.msra.mxu0 %v1542_v17  ;;  %v255_v50 = vld [vmem:[%s1824_s9 + $0xe0] sm:$0xff]  ;;  %v256_v52 = vld [vmem:[%s1824_s9 + $0xe8] sm:$0xff]  ;;  %v257_v54 = vld [vmem:[%s1824_s9 + $0xf0] sm:$0xff]  ;;  %653 = vst.msk [vmem:[#allocation4 + $0x60] sm:$0xff] %vm603_vm0, %v1712_v57 }
  0x25   : > { %1570 = vmatpush3.bf16.msra.mxu1 %v1542_v17  ;;  %1547 = vmatprep.subr.bf16.mxu0 %v1546_v20  ;;  %v242_v55 = vld [vmem:[%s1824_s9 + $0x78] sm:$0xff]  ;;  %655 = vst.msk [vmem:[#allocation4 + $0x70] sm:$0xff] %vm603_vm0, %v1712_v57  ;;  %657 = vst.msk [vmem:[#allocation4 + $0x80] sm:$0xff] %vm603_vm0, %v1712_v57  ;;  %v741_v3 = vld [vmem:[#allocation3] sm:$0xff]  ;;  %v2065_v17 = vrot.slane %v2034_v63, %v807_v5 }
  0x26   : > { %1563 = vmatprep.subr.bf16.mxu1 %v1546_v20  ;;  %v258_v56 = vld [vmem:[%s1824_s9 + $0xf8] sm:$0xff]  ;;  %659 = vst.msk [vmem:[#allocation5] sm:$0xff] %vm603_vm0, %v1712_v57  ;;  %663 = vst.msk [vmem:[#allocation5 + $0x20] sm:$0xff] %vm603_vm0, %v1712_v57  ;;  %v753_v8 = vmul.f32 %v2045_v4, %v741_v3  ;;  %s1654_s9 = scalar_lea.vmem %s1653_s8, 256 }
  0x27   : > { %665 = vst.msk [vmem:[#allocation5 + $0x30] sm:$0xff] %vm603_vm0, %v1712_v57  ;;  %667 = vst.msk [vmem:[#allocation5 + $0x40] sm:$0xff] %vm603_vm0, %v1712_v57  ;;  %p1656_p1 = scmp.lt.s32.totalorder %s1654_s9, %s1648_s6 }
  0x28   : > { %1549 = vmatpush3.bf16.msra.mxu0 %v1546_v20  ;;  %669 = vst.msk [vmem:[#allocation5 + $0x50] sm:$0xff] %vm603_vm0, %v1712_v57  ;;  %671 = vst.msk [vmem:[#allocation5 + $0x60] sm:$0xff] %vm603_vm0, %v1712_v57  ;;  %v761_v21 = vadd.f32 %v753_v8, %v725_v7 }
  0x29   : > { %1571 = vmatpush3.bf16.msra.mxu1 %v1546_v20  ;;  %1551 = vmatprep.subr.bf16.mxu0 %v1550_v23  ;;  %673 = vst.msk [vmem:[#allocation5 + $0x70] sm:$0xff] %vm603_vm0, %v1712_v57  ;;  %675 = vst.msk [vmem:[#allocation5 + $0x80] sm:$0xff] %vm603_vm0, %v1712_v57  ;;  %p1657_p2 = por %p1656_p1, %p1655_p0 }
  0x2a   : > { %1564 = vmatprep.subr.bf16.mxu1 %v1550_v23  ;;  %644 = vst.msk [vmem:[#allocation4 + $0x18] sm:$0x1] %vm605_vm1, %v1712_v57  ;;  %606 = vst.msk [vmem:[#allocation2 + $0x8] sm:$0x1] %vm605_vm1, %v1712_v57 }
  0x2b   : > { %608 = vst.msk [vmem:[#allocation2 + $0x18] sm:$0x1] %vm605_vm1, %v1712_v57  ;;  %610 = vst.msk [vmem:[#allocation2 + $0x28] sm:$0x1] %vm605_vm1, %v1712_v57  ;;  %p1658_p3 = pnand %p1657_p2, %p1651_p13 }
  0x2c   : > { %1553 = vmatpush3.bf16.msra.mxu0 %v1550_v23  ;;  %612 = vst.msk [vmem:[#allocation2 + $0x38] sm:$0x1] %vm605_vm1, %v1712_v57  ;;  %614 = vst.msk [vmem:[#allocation2 + $0x48] sm:$0x1] %vm605_vm1, %v1712_v57 }
  0x2d   : > { %1572 = vmatpush3.bf16.msra.mxu1 %v1550_v23  ;;  %1555 = vmatprep.subr.bf16.mxu0 %v1554_v26  ;;  %616 = vst.msk [vmem:[#allocation2 + $0x58] sm:$0x1] %vm605_vm1, %v1712_v57  ;;  %618 = vst.msk [vmem:[#allocation2 + $0x68] sm:$0x1] %vm605_vm1, %v1712_v57 }
  0x2e   : > { %1565 = vmatprep.subr.bf16.mxu1 %v1554_v26  ;;  %620 = vst.msk [vmem:[#allocation2 + $0x78] sm:$0x1] %vm605_vm1, %v1712_v57  ;;  %622 = vst.msk [vmem:[#allocation2 + $0x88] sm:$0x1] %vm605_vm1, %v1712_v57 }
  0x2f   : > { %624 = vst.msk [vmem:[#allocation3 + $0x8] sm:$0x1] %vm605_vm1, %v1712_v57  ;;  %626 = vst.msk [vmem:[#allocation3 + $0x18] sm:$0x1] %vm605_vm1, %v1712_v57 }
  0x30   : > { %1557 = vmatpush3.bf16.msra.mxu0 %v1554_v26  ;;  %628 = vst.msk [vmem:[#allocation3 + $0x28] sm:$0x1] %vm605_vm1, %v1712_v57  ;;  %630 = vst.msk [vmem:[#allocation3 + $0x38] sm:$0x1] %vm605_vm1, %v1712_v57 }
  0x31   : > { %1573 = vmatpush3.bf16.msra.mxu1 %v1554_v26  ;;  %632 = vst.msk [vmem:[#allocation3 + $0x48] sm:$0x1] %vm605_vm1, %v1712_v57  ;;  %634 = vst.msk [vmem:[#allocation3 + $0x58] sm:$0x1] %vm605_vm1, %v1712_v57  ;;  %v769_v10 = vld [vmem:[#allocation2 + $0x1] sm:$0xff] }
  0x32   : > { %636 = vst.msk [vmem:[#allocation3 + $0x68] sm:$0x1] %vm605_vm1, %v1712_v57  ;;  %638 = vst.msk [vmem:[#allocation3 + $0x78] sm:$0x1] %vm605_vm1, %v1712_v57  ;;  %v781_v22 = vmul.f32 %v2058_v9, %v769_v10 }
  0x33   : > { %1479 = vmatmul.mubr.f32.vlgmr.msra.gmra.mrb[0].mxu0 %v228_v27  ;;  %640 = vst.msk [vmem:[#allocation3 + $0x88] sm:$0x1] %vm605_vm1, %v1712_v57  ;;  %642 = vst.msk [vmem:[#allocation4 + $0x8] sm:$0x1] %vm605_vm1, %v1712_v57 }
  0x34   : > { %1503 = vmatmul.mubr.f32.vlgmr.msra.gmra.mrb[0].mxu1 %v244_v28  ;;  %1481 = vmatprep.mubr.f32.mxu0 %v229_v29  ;;  %646 = vst.msk [vmem:[#allocation4 + $0x28] sm:$0x1] %vm605_vm1, %v1712_v57  ;;  %648 = vst.msk [vmem:[#allocation4 + $0x38] sm:$0x1] %vm605_vm1, %v1712_v57 }
  0x35   : > { %1505 = vmatprep.mubr.f32.mxu1 %v245_v30  ;;  %650 = vst.msk [vmem:[#allocation4 + $0x48] sm:$0x1] %vm605_vm1, %v1712_v57  ;;  %652 = vst.msk [vmem:[#allocation4 + $0x58] sm:$0x1] %vm605_vm1, %v1712_v57 }
  0x36   : > { %654 = vst.msk [vmem:[#allocation4 + $0x68] sm:$0x1] %vm605_vm1, %v1712_v57  ;;  %656 = vst.msk [vmem:[#allocation4 + $0x78] sm:$0x1] %vm605_vm1, %v1712_v57  ;;  %v797_v23 = vld [vmem:[#allocation3 + $0x1] sm:$0xff] }
  0x37   : > { %1482 = vmatmul.mubr.f32.gmra.mrb[2].mxu0 %v230_v31  ;;  %658 = vst.msk [vmem:[#allocation4 + $0x88] sm:$0x1] %vm605_vm1, %v1712_v57  ;;  %660 = vst.msk [vmem:[#allocation5 + $0x8] sm:$0x1] %vm605_vm1, %v1712_v57 }
  0x38   : > { %1506 = vmatmul.mubr.f32.gmra.mrb[2].mxu1 %v246_v32  ;;  %1484 = vmatprep.mubr.f32.mxu0 %v231_v33  ;;  %662 = vst.msk [vmem:[#allocation5 + $0x18] sm:$0x1] %vm605_vm1, %v1712_v57  ;;  %664 = vst.msk [vmem:[#allocation5 + $0x28] sm:$0x1] %vm605_vm1, %v1712_v57  ;;  %v835_v32 = vsub.s32 4, %v2027_v59  ;;  %v2075_v33 = vrot.slane %v2034_v63, %v863_v18 }
  0x39   : > { %1508 = vmatprep.mubr.f32.mxu1 %v247_v34  ;;  %666 = vst.msk [vmem:[#allocation5 + $0x38] sm:$0x1] %vm605_vm1, %v1712_v57  ;;  %668 = vst.msk [vmem:[#allocation5 + $0x48] sm:$0x1] %vm605_vm1, %v1712_v57 }
  0x3a   : > { %670 = vst.msk [vmem:[#allocation5 + $0x58] sm:$0x1] %vm605_vm1, %v1712_v57  ;;  %672 = vst.msk [vmem:[#allocation5 + $0x68] sm:$0x1] %vm605_vm1, %v1712_v57 }
  0x3b   : > { %1485 = vmatmul.mubr.f32.gmra.mrb[4].mxu0 %v232_v35  ;;  %674 = vst.msk [vmem:[#allocation5 + $0x78] sm:$0x1] %vm605_vm1, %v1712_v57  ;;  %676 = vst.msk [vmem:[#allocation5 + $0x88] sm:$0x1] %vm605_vm1, %v1712_v57 }
  0x3c   : > { %1509 = vmatmul.mubr.f32.gmra.mrb[4].mxu1 %v248_v36  ;;  %1487 = vmatprep.mubr.f32.mxu0 %v233_v37 }
  0x3d   : > { %1511 = vmatprep.mubr.f32.mxu1 %v249_v38 }
  0x3f   : > { %1488 = vmatmul.mubr.f32.gmra.mrb[6].mxu0 %v234_v39 }
  0x40   : > { %1512 = vmatmul.mubr.f32.gmra.mrb[6].mxu1 %v250_v40  ;;  %1490 = vmatprep.mubr.f32.mxu0 %v235_v41 }
  0x41   : > { %1514 = vmatprep.mubr.f32.mxu1 %v251_v42  ;;  %v789_v42 = vadd.f32 %v781_v22, %v761_v21 }
  0x43   : > { %1491 = vmatmul.mubr.f32.gmra.mrb[8].mxu0 %v236_v43  ;;  %v809_v43 = vmul.f32 %v2065_v17, %v797_v23 }
  0x44   : > { %1515 = vmatmul.mubr.f32.gmra.mrb[8].mxu1 %v252_v44  ;;  %1493 = vmatprep.mubr.f32.mxu0 %v237_v45 }
  0x45   : > { %1517 = vmatprep.mubr.f32.mxu1 %v253_v46 }
  0x47   : > { %1494 = vmatmul.mubr.f32.gmra.mrb[10].mxu0 %v238_v47 }
  0x48   : > { %1518 = vmatmul.mubr.f32.gmra.mrb[10].mxu1 %v254_v48  ;;  %1496 = vmatprep.mubr.f32.mxu0 %v239_v49 }
  0x49   : > { %1520 = vmatprep.mubr.f32.mxu1 %v255_v50 }
  0x4b   : > { %1497 = vmatmul.mubr.f32.gmra.mrb[12].mxu0 %v240_v51 }
  0x4c   : > { %1521 = vmatmul.mubr.f32.gmra.mrb[12].mxu1 %v256_v52  ;;  %1499 = vmatprep.mubr.f32.mxu0 %v241_v53  ;;  %v2089_v52 = vrot.slane %v2034_v63, %v835_v32  ;;  %v919_v53 = vsub.s32 7, %v2027_v59 }
  0x4d   : > { %1523 = vmatprep.mubr.f32.mxu1 %v257_v54 }
  0x4f   : > { %1500 = vmatmul.mubr.f32.gmra.mrb[14].mxu0 %v242_v55 }
  0x50   : > { %1524 = vmatmul.mubr.f32.gmra.mrb[14].mxu1 %v258_v56 }
 0x106   : > { %v1480_v11 = vpop.f32.mrb[0].mxu0 }
 0x107   : > { %v1504_v12 = vpop.f32.mrb[0].mxu1  ;;  %v354_v13 = vadd.f32 %v1480_v11, %v2051_v6  ;;  %v348_v15 = vpop.f32.mrb[1].mxu0  ;;  %v2100_v11 = vadd.f32 %v809_v43, %v789_v42 }
 0x108   : > { %v434_v14 = vadd.f32 %v1504_v12, %v2051_v6  ;;  %v428_v16 = vpop.f32.mrb[1].mxu1  ;;  %v349_v19 = vadd.f32 %v2051_v6, %v348_v15  ;;  %v891_v12 = vsub.s32 6, %v2027_v59 }
 0x109   : > { %v429_v20 = vadd.f32 %v2051_v6, %v428_v16  ;;  %vm508_vm2 = vcmp.ge.f32.partialorder %v354_v13, 0.0  ;;  %v540_v24 = vmul.f32 0.2, %v354_v13 }
 0x10a   : > { %vm524_vm3 = vcmp.ge.f32.partialorder %v434_v14, 0.0  ;;  %v556_v25 = vmul.f32 0.2, %v434_v14  ;;  %vm507_vm4 = vcmp.ge.f32.partialorder %v349_v19, 0.0  ;;  %v539_v26 = vmul.f32 0.2, %v349_v19 }
 0x10b   : > { %vm523_vm5 = vcmp.ge.f32.partialorder %v429_v20, 0.0  ;;  %v555_v27 = vmul.f32 0.2, %v429_v20  ;;  %v572_v28 = vsel %vm508_vm2, %v354_v13, %v540_v24  ;;  %v1483_v30 = vpop.f32.mrb[2].mxu0  ;;  %v1507_v31 = vpop.f32.mrb[2].mxu1 }
 0x10c   : > { %v588_v29 = vsel %vm524_vm3, %v434_v14, %v556_v25  ;;  %704 = vst.msk [vmem:[#allocation5 + $0x10] sm:$0xff] %vm603_vm0, %v572_v28  ;;  %v571_v34 = vsel %vm507_vm4, %v349_v19, %v539_v26  ;;  %v364_v36 = vadd.f32 %v1483_v30, %v2051_v6  ;;  %v444_v37 = vadd.f32 %v1507_v31, %v2051_v6  ;;  %v358_v38 = vpop.f32.mrb[3].mxu0  ;;  %v438_v39 = vpop.f32.mrb[3].mxu1 }
 0x10d   : > { %688 = vst.msk [vmem:[#allocation3 + $0x20] sm:$0xff] %vm603_vm0, %v588_v29  ;;  %v587_v35 = vsel %vm523_vm5, %v429_v20, %v555_v27  ;;  %703 = vst.msk [vmem:[#allocation5] sm:$0xff] %vm603_vm0, %v571_v34  ;;  %v359_v40 = vadd.f32 %v2051_v6, %v358_v38  ;;  %v439_v41 = vadd.f32 %v2051_v6, %v438_v39 }
 0x10e   : > { %687 = vst.msk [vmem:[#allocation3 + $0x10] sm:$0xff] %vm603_vm0, %v587_v35  ;;  %vm510_vm6 = vcmp.ge.f32.partialorder %v364_v36, 0.0  ;;  %v542_v44 = vmul.f32 0.2, %v364_v36  ;;  %vm526_vm7 = vcmp.ge.f32.partialorder %v444_v37, 0.0  ;;  %v1486_v50 = vpop.f32.mrb[4].mxu0 }
 0x10f   : > { %v558_v45 = vmul.f32 0.2, %v444_v37  ;;  %vm509_vm8 = vcmp.ge.f32.partialorder %v359_v40, 0.0  ;;  %v541_v46 = vmul.f32 0.2, %v359_v40  ;;  %vm525_vm9 = vcmp.ge.f32.partialorder %v439_v41, 0.0 }
 0x110   : > { %v557_v47 = vmul.f32 0.2, %v439_v41  ;;  %v574_v48 = vsel %vm510_vm6, %v364_v36, %v542_v44  ;;  %v1510_v51 = vpop.f32.mrb[4].mxu1  ;;  %v374_v56 = vadd.f32 %v1486_v50, %v2051_v6  ;;  %v368_v61 = vpop.f32.mrb[5].mxu0 }
 0x111   : > { %v590_v49 = vsel %vm526_vm7, %v444_v37, %v558_v45  ;;  %706 = vst.msk [vmem:[#allocation5 + $0x30] sm:$0xff] %vm603_vm0, %v574_v48  ;;  %v573_v54 = vsel %vm509_vm8, %v359_v40, %v541_v46  ;;  %v454_v57 = vadd.f32 %v1510_v51, %v2051_v6  ;;  %v448_v2 = vpop.f32.mrb[5].mxu1  ;;  %v369_v3 = vadd.f32 %v2051_v6, %v368_v61 }
 0x112   : > { %690 = vst.msk [vmem:[#allocation3 + $0x40] sm:$0xff] %vm603_vm0, %v590_v49  ;;  %v589_v55 = vsel %vm525_vm9, %v439_v41, %v557_v47  ;;  %705 = vst.msk [vmem:[#allocation5 + $0x20] sm:$0xff] %vm603_vm0, %v573_v54  ;;  %v449_v7 = vadd.f32 %v2051_v6, %v448_v2  ;;  %v1489_v8 = vpop.f32.mrb[6].mxu0  ;;  %vm512_vm10 = vcmp.ge.f32.partialorder %v374_v56, 0.0  ;;  %v544_v13 = vmul.f32 0.2, %v374_v56 }
 0x113   : > { %689 = vst.msk [vmem:[#allocation3 + $0x30] sm:$0xff] %vm603_vm0, %v589_v55  ;;  %v1513_v10 = vpop.f32.mrb[6].mxu1  ;;  %vm528_vm11 = vcmp.ge.f32.partialorder %v454_v57, 0.0  ;;  %v560_v14 = vmul.f32 0.2, %v454_v57  ;;  %vm511_vm12 = vcmp.ge.f32.partialorder %v369_v3, 0.0  ;;  %v384_v21 = vadd.f32 %v1489_v8, %v2051_v6 }
 0x114   : > { %v543_v15 = vmul.f32 0.2, %v369_v3  ;;  %vm527_vm13 = vcmp.ge.f32.partialorder %v449_v7, 0.0  ;;  %v559_v16 = vmul.f32 0.2, %v449_v7  ;;  %v576_v19 = vsel %vm512_vm10, %v374_v56, %v544_v13  ;;  %v378_v23 = vpop.f32.mrb[7].mxu0 }
 0x115   : > { %v592_v20 = vsel %vm528_vm11, %v454_v57, %v560_v14  ;;  %v464_v22 = vadd.f32 %v1513_v10, %v2051_v6  ;;  %v458_v24 = vpop.f32.mrb[7].mxu1  ;;  %708 = vst.msk [vmem:[#allocation5 + $0x50] sm:$0xff] %vm603_vm0, %v576_v19  ;;  %v379_v27 = vadd.f32 %v2051_v6, %v378_v23  ;;  %vm514_vm14 = vcmp.ge.f32.partialorder %v384_v21, 0.0 }
 0x116   : > { %692 = vst.msk [vmem:[#allocation3 + $0x60] sm:$0xff] %vm603_vm0, %v592_v20  ;;  %v575_v25 = vsel %vm511_vm12, %v369_v3, %v543_v15  ;;  %v591_v26 = vsel %vm527_vm13, %v449_v7, %v559_v16  ;;  %v459_v28 = vadd.f32 %v2051_v6, %v458_v24  ;;  %v1492_v29 = vpop.f32.mrb[8].mxu0  ;;  %v546_v31 = vmul.f32 0.2, %v384_v21 }
 0x117   : > { %v1516_v30 = vpop.f32.mrb[8].mxu1  ;;  %707 = vst.msk [vmem:[#allocation5 + $0x40] sm:$0xff] %vm603_vm0, %v575_v25  ;;  %691 = vst.msk [vmem:[#allocation3 + $0x50] sm:$0xff] %vm603_vm0, %v591_v26  ;;  %vm530_vm15 = vcmp.ge.f32.partialorder %v464_v22, 0.0  ;;  %v562_v34 = vmul.f32 0.2, %v464_v22  ;;  %v394_v39 = vadd.f32 %v1492_v29, %v2051_v6 }
 0x118   : > { %vm513_vm1 = vcmp.ge.f32.partialorder %v379_v27, 0.0  ;;  %v545_v35 = vmul.f32 0.2, %v379_v27  ;;  %vm529_vm2 = vcmp.ge.f32.partialorder %v459_v28, 0.0  ;;  %v561_v36 = vmul.f32 0.2, %v459_v28 }
 0x119   : > { %v578_v37 = vsel %vm514_vm14, %v384_v21, %v546_v31  ;;  %v594_v38 = vsel %vm530_vm15, %v464_v22, %v562_v34  ;;  %v474_v40 = vadd.f32 %v1516_v30, %v2051_v6  ;;  %v388_v41 = vpop.f32.mrb[9].mxu0  ;;  %v468_v42 = vpop.f32.mrb[9].mxu1  ;;  %vm516_vm3 = vcmp.ge.f32.partialorder %v394_v39, 0.0 }
 0x11a   : > { %710 = vst.msk [vmem:[#allocation5 + $0x70] sm:$0xff] %vm603_vm0, %v578_v37  ;;  %694 = vst.msk [vmem:[#allocation3 + $0x80] sm:$0xff] %vm603_vm0, %v594_v38  ;;  %v577_v43 = vsel %vm513_vm1, %v379_v27, %v545_v35  ;;  %v593_v44 = vsel %vm529_vm2, %v459_v28, %v561_v36  ;;  %v389_v45 = vadd.f32 %v2051_v6, %v388_v41  ;;  %v1495_v47 = vpop.f32.mrb[10].mxu0  ;;  %v548_v49 = vmul.f32 0.2, %v394_v39 }
 0x11b   : > { %v469_v46 = vadd.f32 %v2051_v6, %v468_v42  ;;  %v1519_v48 = vpop.f32.mrb[10].mxu1  ;;  %709 = vst.msk [vmem:[#allocation5 + $0x60] sm:$0xff] %vm603_vm0, %v577_v43  ;;  %693 = vst.msk [vmem:[#allocation3 + $0x70] sm:$0xff] %vm603_vm0, %v593_v44  ;;  %vm532_vm4 = vcmp.ge.f32.partialorder %v474_v40, 0.0  ;;  %v564_v50 = vmul.f32 0.2, %v474_v40  ;;  %v404_v57 = vadd.f32 %v1495_v47, %v2051_v6 }
 0x11c   : > { %vm515_vm5 = vcmp.ge.f32.partialorder %v389_v45, 0.0  ;;  %v547_v51 = vmul.f32 0.2, %v389_v45  ;;  %v580_v55 = vsel %vm516_vm3, %v394_v39, %v548_v49  ;;  %v484_v61 = vadd.f32 %v1519_v48, %v2051_v6  ;;  %v398_v2 = vpop.f32.mrb[11].mxu0  ;;  %v478_v3 = vpop.f32.mrb[11].mxu1 }
 0x11d   : > { %vm531_vm6 = vcmp.ge.f32.partialorder %v469_v46, 0.0  ;;  %v563_v54 = vmul.f32 0.2, %v469_v46  ;;  %v596_v56 = vsel %vm532_vm4, %v474_v40, %v564_v50  ;;  %696 = vst.msk [vmem:[#allocation4 + $0x11] sm:$0xff] %vm603_vm0, %v580_v55  ;;  %v399_v10 = vadd.f32 %v2051_v6, %v398_v2 }
 0x11e   : > { %679 = vst.msk [vmem:[#allocation2 + $0x21] sm:$0xff] %vm603_vm0, %v596_v56  ;;  %v579_v7 = vsel %vm515_vm5, %v389_v45, %v547_v51  ;;  %v479_v13 = vadd.f32 %v2051_v6, %v478_v3  ;;  %v1498_v14 = vpop.f32.mrb[12].mxu0  ;;  %vm518_vm7 = vcmp.ge.f32.partialorder %v404_v57, 0.0  ;;  %v550_v16 = vmul.f32 0.2, %v404_v57  ;;  %v853_v51 = vld [vmem:[#allocation5] sm:$0xff] }
 0x11f   : > { %v595_v8 = vsel %vm531_vm6, %v469_v46, %v563_v54  ;;  %v1522_v15 = vpop.f32.mrb[12].mxu1  ;;  %695 = vst.msk [vmem:[#allocation4 + $0x1] sm:$0xff] %vm603_vm0, %v579_v7  ;;  %vm534_vm8 = vcmp.ge.f32.partialorder %v484_v61, 0.0  ;;  %v566_v19 = vmul.f32 0.2, %v484_v61  ;;  %vm517_vm9 = vcmp.ge.f32.partialorder %v399_v10, 0.0 }
 0x120   : > { %678 = vst.msk [vmem:[#allocation2 + $0x11] sm:$0xff] %vm603_vm0, %v595_v8  ;;  %v549_v20 = vmul.f32 0.2, %v399_v10  ;;  %vm533_vm10 = vcmp.ge.f32.partialorder %v479_v13, 0.0  ;;  %v565_v21 = vmul.f32 0.2, %v479_v13  ;;  %v582_v22 = vsel %vm518_vm7, %v404_v57, %v550_v16 }
 0x121   : > { %v598_v23 = vsel %vm534_vm8, %v484_v61, %v566_v19  ;;  %v414_v24 = vadd.f32 %v1498_v14, %v2051_v6  ;;  %v494_v25 = vadd.f32 %v1522_v15, %v2051_v6  ;;  %v408_v26 = vpop.f32.mrb[13].mxu0  ;;  %v488_v27 = vpop.f32.mrb[13].mxu1  ;;  %698 = vst.msk [vmem:[#allocation4 + $0x31] sm:$0xff] %vm603_vm0, %v582_v22  ;;  %v2153_v14 = vld [vmem:[#allocation3 + $0x20] sm:$0xff]  ;;  %v712_v15 = vld [vmem:[%s2422_s3 + $0x8] sm:$0xff]  ;;  %v865_v19 = vmul.f32 %v2075_v33, %v853_v51 }
 0x122   : > { %681 = vst.msk [vmem:[#allocation2 + $0x41] sm:$0xff] %vm603_vm0, %v598_v23  ;;  %v581_v28 = vsel %vm517_vm9, %v399_v10, %v549_v20  ;;  %v597_v29 = vsel %vm533_vm10, %v479_v13, %v565_v21  ;;  %v409_v30 = vadd.f32 %v2051_v6, %v408_v26  ;;  %v489_v31 = vadd.f32 %v2051_v6, %v488_v27  ;;  %v1501_v34 = vpop.f32.mrb[14].mxu0  ;;  %v909_v21 = vld [vmem:[#allocation5 + $0x1] sm:$0xff] }
 0x123   : > { %v1525_v35 = vpop.f32.mrb[14].mxu1  ;;  %697 = vst.msk [vmem:[#allocation4 + $0x21] sm:$0xff] %vm603_vm0, %v581_v28  ;;  %680 = vst.msk [vmem:[#allocation2 + $0x31] sm:$0xff] %vm603_vm0, %v597_v29  ;;  %vm520_vm11 = vcmp.ge.f32.partialorder %v414_v24, 0.0  ;;  %v552_v36 = vmul.f32 0.2, %v414_v24  ;;  %v424_v42 = vadd.f32 %v1501_v34, %v2051_v6  ;;  %v2165_v20 = vrot.slane %v2034_v63, %v919_v53 }
 0x124   : > { %vm536_vm12 = vcmp.ge.f32.partialorder %v494_v25, 0.0  ;;  %v568_v37 = vmul.f32 0.2, %v494_v25  ;;  %vm519_vm13 = vcmp.ge.f32.partialorder %v409_v30, 0.0  ;;  %v551_v38 = vmul.f32 0.2, %v409_v30 }
 0x125   : > { %vm535_vm14 = vcmp.ge.f32.partialorder %v489_v31, 0.0  ;;  %v567_v39 = vmul.f32 0.2, %v489_v31  ;;  %v584_v40 = vsel %vm520_vm11, %v414_v24, %v552_v36  ;;  %v504_v43 = vadd.f32 %v1525_v35, %v2051_v6  ;;  %v418_v44 = vpop.f32.mrb[15].mxu0  ;;  %v498_v45 = vpop.f32.mrb[15].mxu1  ;;  %v2151_v13 = vld [vmem:[#allocation2 + $0x20] sm:$0xff] }
 0x126   : > { %v600_v41 = vsel %vm536_vm12, %v494_v25, %v568_v37  ;;  %700 = vst.msk [vmem:[#allocation4 + $0x51] sm:$0xff] %vm603_vm0, %v584_v40  ;;  %v583_v46 = vsel %vm519_vm13, %v409_v30, %v551_v38  ;;  %v419_v48 = vadd.f32 %v2051_v6, %v418_v44  ;;  %v499_v49 = vadd.f32 %v2051_v6, %v498_v45  ;;  %v825_v50 = vld [vmem:[#allocation4] sm:$0xff]  ;;  %v2194_v30 = vld [vmem:[#allocation3 + $0x21] sm:$0xff] }
 0x127   : > { %683 = vst.msk [vmem:[#allocation2 + $0x61] sm:$0xff] %vm603_vm0, %v600_v41  ;;  %v599_v47 = vsel %vm535_vm14, %v489_v31, %v567_v39  ;;  %699 = vst.msk [vmem:[#allocation4 + $0x41] sm:$0xff] %vm603_vm0, %v583_v46  ;;  %vm522_vm15 = vcmp.ge.f32.partialorder %v424_v42, 0.0  ;;  %v554_v54 = vmul.f32 0.2, %v424_v42  ;;  %vm538_vm1 = vcmp.ge.f32.partialorder %v504_v43, 0.0 }
 0x128   : > { %682 = vst.msk [vmem:[#allocation2 + $0x51] sm:$0xff] %vm603_vm0, %v599_v47  ;;  %v570_v55 = vmul.f32 0.2, %v504_v43  ;;  %vm521_vm2 = vcmp.ge.f32.partialorder %v419_v48, 0.0  ;;  %v553_v56 = vmul.f32 0.2, %v419_v48  ;;  %v837_v3 = vmul.f32 %v2089_v52, %v825_v50 }
 0x129   : > { %vm537_vm3 = vcmp.ge.f32.partialorder %v499_v49, 0.0  ;;  %v569_v57 = vmul.f32 0.2, %v499_v49  ;;  %v586_v61 = vsel %vm522_vm15, %v424_v42, %v554_v54  ;;  %v2147_v6 = vrot.slane %v2034_v63, %v891_v12  ;;  %v881_v10 = vld [vmem:[#allocation4 + $0x1] sm:$0xff]  ;;  %v937_v26 = vld [vmem:[#allocation2 + $0x10] sm:$0xff] }
 0x12a   : > { %v602_v2 = vsel %vm538_vm1, %v504_v43, %v570_v55  ;;  %702 = vst.msk [vmem:[#allocation4 + $0x71] sm:$0xff] %vm603_vm0, %v586_v61  ;;  %v585_v7 = vsel %vm521_vm2, %v419_v48, %v553_v56  ;;  %v845_v16 = vadd.f32 %v837_v3, %v2100_v11  ;;  %v2169_v22 = vrot.slane %v712_v15, %v723_v60  ;;  %v2171_v23 = vld [vmem:[#allocation2 + $0x21] sm:$0xff]  ;;  %v993_v36 = vld [vmem:[#allocation2 + $0x11] sm:$0xff] }
 0x12b   : > { %685 = vst.msk [vmem:[#allocation2 + $0x81] sm:$0xff] %vm603_vm0, %v602_v2  ;;  %v601_v8 = vsel %vm537_vm3, %v499_v49, %v569_v57  ;;  %701 = vst.msk [vmem:[#allocation4 + $0x61] sm:$0xff] %vm603_vm0, %v585_v7  ;;  %v893_v25 = vmul.f32 %v2147_v6, %v881_v10  ;;  %v727_v11 = vmul.f32 %v2039_v0, %v2151_v13  ;;  %v2196_v31 = vld [vmem:[#allocation4 + $0x20] sm:$0xff]  ;;  %v1050_v39 = vld [vmem:[#allocation4 + $0x10] sm:$0xff]  ;;  %vm1297_vm4 = vcmask 1042434  }
 0x12c   : > { %684 = vst.msk [vmem:[#allocation2 + $0x71] sm:$0xff] %vm603_vm0, %v601_v8  ;;  %v873_v24 = vadd.f32 %v865_v19, %v845_v16  ;;  %v755_v27 = vmul.f32 %v2045_v4, %v2153_v14  ;;  %v2180_v63 = vrot.slane %v712_v15, %v751_v62  ;;  %v2184_v60 = vrot.slane %v712_v15, %v779_v1  ;;  %v965_v35 = vld [vmem:[#allocation3 + $0x10] sm:$0xff]  ;;  %v1107_v44 = vld [vmem:[#allocation4 + $0x11] sm:$0xff] }
 0x12d   : > { %v2188_v28 = vrot.slane %v712_v15, %v807_v5  ;;  %v2192_v29 = vrot.slane %v712_v15, %v835_v32  ;;  %v921_v62 = vmul.f32 %v2165_v20, %v909_v21  ;;  %v783_v1 = vmul.f32 %v2058_v9, %v2171_v23  ;;  %v1021_v38 = vld [vmem:[#allocation3 + $0x11] sm:$0xff]  ;;  %v2220_v49 = vld [vmem:[#allocation5 + $0x20] sm:$0xff] }
 0x12e   : > { %v901_v34 = vadd.f32 %v893_v25, %v873_v24  ;;  %v763_v37 = vadd.f32 %v755_v27, %v727_v11  ;;  %v949_v5 = vmul.f32 %v2169_v22, %v937_v26  ;;  %v2204_v32 = vrot.slane %v712_v15, %v863_v18  ;;  %v1079_v43 = vld [vmem:[#allocation5 + $0x10] sm:$0xff]  ;;  %v2228_v61 = vld [vmem:[#allocation5 + $0x21] sm:$0xff] }
 0x12f   : > { %v2208_v40 = vrot.slane %v712_v15, %v891_v12  ;;  %v2212_v41 = vrot.slane %v712_v15, %v919_v53  ;;  %v811_v46 = vmul.f32 %v2065_v17, %v2194_v30  ;;  %v839_v47 = vmul.f32 %v2089_v52, %v2196_v31  ;;  %v1135_v12 = vld [vmem:[#allocation5 + $0x11] sm:$0xff]  ;;  %v939_v7 = vld [vmem:[#allocation2 + $0x30] sm:$0xff] }
 0x130   : > { %v929_v42 = vadd.f32 %v921_v62, %v901_v34  ;;  %v791_v45 = vadd.f32 %v783_v1, %v763_v37  ;;  %v977_v18 = vmul.f32 %v2180_v63, %v965_v35  ;;  %v1005_v48 = vmul.f32 %v2184_v60, %v993_v36  ;;  %v2226_v57 = vld [vmem:[#allocation4 + $0x21] sm:$0xff]  ;;  %v995_v25 = vld [vmem:[#allocation2 + $0x31] sm:$0xff] }
 0x131   : > { %v726_v53 = vmul.f32 %v937_v26, %v2039_v0  ;;  %v754_v50 = vmul.f32 %v965_v35, %v2045_v4  ;;  %v1033_v54 = vmul.f32 %v2188_v28, %v1021_v38  ;;  %v1062_v55 = vmul.f32 %v2192_v29, %v1050_v39  ;;  %v967_v8 = vld [vmem:[#allocation3 + $0x30] sm:$0xff] }
 0x132   : > { %v957_v51 = vadd.f32 %v949_v5, %v929_v42  ;;  %v819_v56 = vadd.f32 %v811_v46, %v791_v45  ;;  %v1091_v2 = vmul.f32 %v2204_v32, %v1079_v43  ;;  %v1119_v3 = vmul.f32 %v2208_v40, %v1107_v44  ;;  %v1023_v27 = vld [vmem:[#allocation3 + $0x31] sm:$0xff]  ;;  %v1052_v5 = vld [vmem:[#allocation4 + $0x30] sm:$0xff] }
 0x133   : > { %v762_v10 = vadd.f32 %v754_v50, %v726_v53  ;;  %v782_v15 = vmul.f32 %v993_v36, %v2058_v9  ;;  %v1147_v19 = vmul.f32 %v2212_v41, %v1135_v12  ;;  %v867_v24 = vmul.f32 %v2075_v33, %v2220_v49  ;;  %v1081_v42 = vld [vmem:[#allocation5 + $0x30] sm:$0xff] }
 0x134   : > { %v985_v16 = vadd.f32 %v977_v18, %v957_v51  ;;  %v847_v21 = vadd.f32 %v839_v47, %v819_v56  ;;  %v895_v26 = vmul.f32 %v2147_v6, %v2226_v57  ;;  %v923_v11 = vmul.f32 %v2165_v20, %v2228_v61 }
 0x135   : > { %v790_v34 = vadd.f32 %v782_v15, %v762_v10  ;;  %v810_v62 = vmul.f32 %v1021_v38, %v2065_v17  ;;  %v951_v37 = vmul.f32 %v2169_v22, %v939_v7  ;;  %v979_v1 = vmul.f32 %v2180_v63, %v967_v8  ;;  %v1109_v38 = vld [vmem:[#allocation4 + $0x31] sm:$0xff] }
 0x136   : > { %v1013_v35 = vadd.f32 %v1005_v48, %v985_v16  ;;  %v875_v36 = vadd.f32 %v867_v24, %v847_v21  ;;  %v1007_v45 = vmul.f32 %v2184_v60, %v995_v25  ;;  %v838_v47 = vmul.f32 %v1050_v39, %v2089_v52  ;;  %v1137_v48 = vld [vmem:[#allocation5 + $0x31] sm:$0xff] }
 0x137   : > { %v818_v46 = vadd.f32 %v810_v62, %v790_v34  ;;  %v728_v18 = vmul.f32 %v939_v7, %v2039_v0  ;;  %v1035_v51 = vmul.f32 %v2188_v28, %v1023_v27  ;;  %v756_v56 = vmul.f32 %v967_v8, %v2045_v4 }
 0x138   : > { %v1041_v53 = vadd.f32 %v1033_v54, %v1013_v35  ;;  %v903_v50 = vadd.f32 %v895_v26, %v875_v36  ;;  %v1064_v10 = vmul.f32 %v2192_v29, %v1052_v5  ;;  %v1093_v15 = vmul.f32 %v2204_v32, %v1081_v42 }
 0x139   : > { %v846_v16 = vadd.f32 %v838_v47, %v818_v46  ;;  %v866_v21 = vmul.f32 %v1079_v43, %v2075_v33  ;;  %v764_v39 = vadd.f32 %v756_v56, %v728_v18  ;;  %v784_v7 = vmul.f32 %v995_v25, %v2058_v9  ;;  %v940_v43 = vld [vmem:[#allocation2 + $0x40] sm:$0xff] }
 0x13a   : > { %v1070_v24 = vadd.f32 %v1062_v55, %v1041_v53  ;;  %v931_v34 = vadd.f32 %v923_v11, %v903_v50  ;;  %v2253_v54 = vmul.f32 %v2208_v40, %v1109_v38  ;;  %v2256_v26 = vmul.f32 %v2212_v41, %v1137_v48  ;;  %v968_v55 = vld [vmem:[#allocation3 + $0x40] sm:$0xff] }
 0x13b   : > { %v874_v62 = vadd.f32 %v866_v21, %v846_v16  ;;  %v894_v8 = vmul.f32 %v1107_v44, %v2147_v6  ;;  %v792_v58 = vadd.f32 %v784_v7, %v764_v39  ;;  %v812_v46 = vmul.f32 %v1023_v27, %v2065_v17 }
 0x13c   : > { %v1099_v35 = vadd.f32 %v1091_v2, %v1070_v24  ;;  %v959_v36 = vadd.f32 %v951_v37, %v931_v34  ;;  %v922_v47 = vmul.f32 %v1135_v12, %v2165_v20  ;;  %v950_v25 = vmul.f32 %v2169_v22, %v2151_v13  ;;  %v996_v2 = vld [vmem:[#allocation2 + $0x41] sm:$0xff] }
 0x13d   : > { %v902_v11 = vadd.f32 %v894_v8, %v874_v62  ;;  %v978_v18 = vmul.f32 %v2180_v63, %v2153_v14  ;;  %v820_v56 = vadd.f32 %v812_v46, %v792_v58  ;;  %v840_v44 = vmul.f32 %v1052_v5, %v2089_v52  ;;  %v1024_v14 = vld [vmem:[#allocation3 + $0x41] sm:$0xff] }
 0x13e   : > { %v1127_v53 = vadd.f32 %v1119_v3, %v1099_v35  ;;  %v987_v50 = vadd.f32 %v979_v1, %v959_v36  ;;  %v1006_v27 = vmul.f32 %v2184_v60, %v2171_v23  ;;  %v729_v16 = vmul.f32 %v940_v43, %v2039_v0  ;;  %v1053_v3 = vld [vmem:[#allocation4 + $0x40] sm:$0xff] }
 0x13f   : > { %v930_v37 = vadd.f32 %v922_v47, %v902_v11  ;;  %v757_v12 = vmul.f32 %v968_v55, %v2045_v4  ;;  %v848_v13 = vadd.f32 %v840_v44, %v820_v56  ;;  %v868_v34 = vmul.f32 %v1081_v42, %v2075_v33  ;;  %v1082_v47 = vld [vmem:[#allocation5 + $0x40] sm:$0xff] }
 0x140   : > { %v1155_v21 = vadd.f32 %v1147_v19, %v1127_v53  ;;  %v1015_v24 = vadd.f32 %v1007_v45, %v987_v50  ;;  %v1034_v58 = vmul.f32 %v2188_v28, %v2194_v30  ;;  %v785_v39 = vmul.f32 %v996_v2, %v2058_v9  ;;  %v941_v53 = vld [vmem:[#allocation2 + $0x50] sm:$0xff]  ;;  %v969_v50 = vld [vmem:[#allocation3 + $0x50] sm:$0xff] }
 0x141   : > { %v958_v1 = vadd.f32 %v950_v25, %v930_v37  ;;  %v765_v5 = vadd.f32 %v757_v12, %v729_v16  ;;  %v876_v62 = vadd.f32 %v868_v34, %v848_v13  ;;  %v896_v8 = vmul.f32 %v1109_v38, %v2147_v6  ;;  %v1110_v37 = vld [vmem:[#allocation4 + $0x41] sm:$0xff]  ;;  %v997_v12 = vld [vmem:[#allocation2 + $0x51] sm:$0xff] }
 0x142   : > { %v1163_v23 = vsel %vm603_vm0, %v1155_v21, 0.0  ;;  %v1043_v7 = vadd.f32 %v1035_v51, %v1015_v24  ;;  %v813_v42 = vmul.f32 %v1024_v14, %v2065_v17  ;;  %v841_v35 = vmul.f32 %v1053_v3, %v2089_v52  ;;  %v1138_v24 = vld [vmem:[#allocation5 + $0x41] sm:$0xff] }
 0x143   : > { %1164 = vadd.xlane.f32.xlu0 %v1163_v23  ;;  %v986_v19 = vadd.f32 %v978_v18, %v958_v1  ;;  %v793_v45 = vadd.f32 %v785_v39, %v765_v5  ;;  %v1063_v30 = vmul.f32 %v2192_v29, %v2196_v31  ;;  %v904_v46 = vadd.f32 %v896_v8, %v876_v62 }
 0x144   : > { %v1072_v36 = vadd.f32 %v1064_v10, %v1043_v7  ;;  %v924_v11 = vmul.f32 %v1137_v48, %v2165_v20  ;;  %v1092_v51 = vmul.f32 %v2204_v32, %v2220_v49  ;;  %v1120_v38 = vmul.f32 %v2208_v40, %v2226_v57 }
 0x145   : > { %v1014_v25 = vadd.f32 %v1006_v27, %v986_v19  ;;  %v821_v18 = vadd.f32 %v813_v42, %v793_v45  ;;  %v1148_v10 = vmul.f32 %v2212_v41, %v2228_v61  ;;  %v952_v31 = vmul.f32 %v2169_v22, %v940_v43  ;;  %v1054_v19 = vld [vmem:[#allocation4 + $0x50] sm:$0xff] }
 0x146   : > { %v1101_v56 = vadd.f32 %v1093_v15, %v1072_v36  ;;  %v932_v44 = vadd.f32 %v924_v11, %v904_v46  ;;  %v980_v27 = vmul.f32 %v2180_v63, %v968_v55  ;;  %v869_v49 = vmul.f32 %v1082_v47, %v2075_v33  ;;  %v1083_v11 = vld [vmem:[#allocation5 + $0x50] sm:$0xff] }
 0x147   : > { %v1042_v48 = vadd.f32 %v1034_v58, %v1014_v25  ;;  %v849_v16 = vadd.f32 %v841_v35, %v821_v18  ;;  %v730_v15 = vmul.f32 %v941_v53, %v2039_v0  ;;  %v758_v13 = vmul.f32 %v969_v50, %v2045_v4  ;;  %v1025_v58 = vld [vmem:[#allocation3 + $0x51] sm:$0xff] }
 0x148   : > { %v1129_v57 = vadd.f32 %v2253_v54, %v1101_v56  ;;  %v960_v21 = vadd.f32 %v952_v31, %v932_v44  ;;  %v1008_v34 = vmul.f32 %v2184_v60, %v996_v2  ;;  %v897_v1 = vmul.f32 %v1110_v37, %v2147_v6  ;;  %v942_v56 = vld [vmem:[#allocation2 + $0x60] sm:$0xff]  ;;  %v970_v44 = vld [vmem:[#allocation3 + $0x60] sm:$0xff] }
 0x149   : > { %v1071_v61 = vadd.f32 %v1063_v30, %v1042_v48  ;;  %v877_v43 = vadd.f32 %v869_v49, %v849_v16  ;;  %v766_v39 = vadd.f32 %v758_v13, %v730_v15  ;;  %v786_v23 = vmul.f32 %v997_v12, %v2058_v9  ;;  %v1111_v16 = vld [vmem:[#allocation4 + $0x51] sm:$0xff]  ;;  %v1139_v13 = vld [vmem:[#allocation5 + $0x51] sm:$0xff] }
 0x14a   : > { %v1157_v55 = vadd.f32 %v2256_v26, %v1129_v57  ;;  %v988_v5 = vadd.f32 %v980_v27, %v960_v21  ;;  %v1036_v7 = vmul.f32 %v2188_v28, %v1024_v14  ;;  %v925_v8 = vmul.f32 %v1138_v24, %v2165_v20  ;;  %v998_v21 = vld [vmem:[#allocation2 + $0x61] sm:$0xff] }
 0x14b   : > { %v1100_v54 = vadd.f32 %v1092_v51, %v1071_v61  ;;  %v905_v62 = vadd.f32 %v897_v1, %v877_v43  ;;  %v794_v42 = vadd.f32 %v786_v23, %v766_v39  ;;  %v814_v35 = vmul.f32 %v1025_v58, %v2065_v17  ;;  %v1055_v1 = vld [vmem:[#allocation4 + $0x60] sm:$0xff] }
 0x14c   : > { %v1169_v45 = vsel %vm603_vm0, %v1157_v55, 0.0  ;;  %v1016_v2 = vadd.f32 %v1008_v34, %v988_v5  ;;  %v1065_v26 = vmul.f32 %v2192_v29, %v1053_v3  ;;  %v953_v46 = vmul.f32 %v2169_v22, %v941_v53 }
 0x14d   : > { %1170 = vadd.xlane.f32.xlu1 %v1169_v45  ;;  %v1128_v36 = vadd.f32 %v1120_v38, %v1100_v54  ;;  %v933_v30 = vadd.f32 %v925_v8, %v905_v62  ;;  %v1094_v14 = vmul.f32 %v2204_v32, %v1082_v47  ;;  %v822_v51 = vadd.f32 %v814_v35, %v794_v42 }
 0x14e   : > { %v1044_v25 = vadd.f32 %v1036_v7, %v1016_v2  ;;  %v842_v18 = vmul.f32 %v1054_v19, %v2089_v52  ;;  %v1122_v48 = vmul.f32 %v2208_v40, %v1110_v37  ;;  %v981_v38 = vmul.f32 %v2180_v63, %v969_v50  ;;  %v1084_v2 = vld [vmem:[#allocation5 + $0x60] sm:$0xff] }
 0x14f   : > { %v1156_v31 = vadd.f32 %v1148_v10, %v1128_v36  ;;  %v961_v27 = vadd.f32 %v953_v46, %v933_v30  ;;  %v1009_v49 = vmul.f32 %v2184_v60, %v997_v12  ;;  %v870_v57 = vmul.f32 %v1083_v11, %v2075_v33  ;;  %v1026_v12 = vld [vmem:[#allocation3 + $0x61] sm:$0xff]  ;;  %v971_v46 = vld [vmem:[#allocation3 + $0x70] sm:$0xff] }
 0x150   : > { %v1073_v3 = vadd.f32 %v1065_v26, %v1044_v25  ;;  %v850_v53 = vadd.f32 %v842_v18, %v822_v51  ;;  %v731_v61 = vmul.f32 %v942_v56, %v2039_v0  ;;  %v759_v10 = vmul.f32 %v970_v44, %v2045_v4  ;;  %v943_v30 = vld [vmem:[#allocation2 + $0x70] sm:$0xff] }
 0x151   : > { %v1166_v47 = vsel %vm603_vm0, %v1156_v31, 0.0  ;;  %v989_v15 = vadd.f32 %v981_v38, %v961_v27  ;;  %v1150_v50 = vmul.f32 %v2212_v41, %v1138_v24  ;;  %v898_v43 = vmul.f32 %v1111_v16, %v2147_v6  ;;  %v999_v18 = vld [vmem:[#allocation2 + $0x71] sm:$0xff]  ;;  %v1112_v38 = vld [vmem:[#allocation4 + $0x61] sm:$0xff] }
 0x152   : > { %1167 = vadd.xlane.f32.xlu0 %v1166_v47  ;;  %v1102_v37 = vadd.f32 %v1094_v14, %v1073_v3  ;;  %v878_v34 = vadd.f32 %v870_v57, %v850_v53  ;;  %v1037_v5 = vmul.f32 %v2188_v28, %v1025_v58  ;;  %v767_v39 = vadd.f32 %v759_v10, %v731_v61  ;;  %v1027_v61 = vld [vmem:[#allocation3 + $0x71] sm:$0xff] }
 0x153   : > { %v1017_v55 = vadd.f32 %v1009_v49, %v989_v15  ;;  %v787_v23 = vmul.f32 %v998_v21, %v2058_v9  ;;  %v1066_v7 = vmul.f32 %v2192_v29, %v1054_v19  ;;  %v926_v8 = vmul.f32 %v1139_v13, %v2165_v20 }
 0x154   : > { %v1130_v54 = vadd.f32 %v1122_v48, %v1102_v37  ;;  %v906_v62 = vadd.f32 %v898_v43, %v878_v34  ;;  %v815_v42 = vmul.f32 %v1026_v12, %v2065_v17  ;;  %v843_v35 = vmul.f32 %v1055_v1, %v2089_v52 }
 0x155   : > { %v1045_v45 = vadd.f32 %v1037_v5, %v1017_v55  ;;  %v795_v24 = vadd.f32 %v787_v23, %v767_v39  ;;  %v954_v58 = vmul.f32 %v2169_v22, %v942_v56  ;;  %v1095_v14 = vmul.f32 %v2204_v32, %v1083_v11  ;;  %v1140_v56 = vld [vmem:[#allocation5 + $0x61] sm:$0xff] }
 0x156   : > { %v1158_v36 = vadd.f32 %v1150_v50, %v1130_v54  ;;  %v934_v26 = vadd.f32 %v926_v8, %v906_v62  ;;  %v1123_v19 = vmul.f32 %v2208_v40, %v1111_v16  ;;  %v982_v27 = vmul.f32 %v2180_v63, %v970_v44  ;;  %v1056_v5 = vld [vmem:[#allocation4 + $0x70] sm:$0xff] }
 0x157   : > { %v1074_v25 = vadd.f32 %v1066_v7, %v1045_v45  ;;  %v823_v51 = vadd.f32 %v815_v42, %v795_v24  ;;  %v871_v3 = vmul.f32 %v1084_v2, %v2075_v33  ;;  %v732_v57 = vmul.f32 %v943_v30, %v2039_v0  ;;  %v1085_v7 = vld [vmem:[#allocation5 + $0x70] sm:$0xff] }
 0x158   : > { %v1172_v31 = vsel %vm603_vm0, %v1158_v36, 0.0  ;;  %v962_v48 = vadd.f32 %v954_v58, %v934_v26  ;;  %v760_v11 = vmul.f32 %v971_v46, %v2045_v4  ;;  %v1151_v16 = vmul.f32 %v2212_v41, %v1139_v13 }
 0x159   : > { %1173 = vadd.xlane.f32.xlu1 %v1172_v31  ;;  %v1103_v49 = vadd.f32 %v1095_v14, %v1074_v25  ;;  %v851_v53 = vadd.f32 %v843_v35, %v823_v51  ;;  %v1010_v15 = vmul.f32 %v2184_v60, %v998_v21  ;;  %v788_v10 = vmul.f32 %v999_v18, %v2058_v9  ;;  %v1113_v35 = vld [vmem:[#allocation4 + $0x71] sm:$0xff]  ;;  %v1141_v25 = vld [vmem:[#allocation5 + $0x71] sm:$0xff] }
 0x15a   : > { %v990_v47 = vadd.f32 %v982_v27, %v962_v48  ;;  %v899_v50 = vmul.f32 %v1112_v38, %v2147_v6  ;;  %v768_v34 = vadd.f32 %v760_v11, %v732_v57  ;;  %v1038_v55 = vmul.f32 %v2188_v28, %v1026_v12  ;;  %v944_v48 = vld [vmem:[#allocation2 + $0x80] sm:$0xff] }
 0x15b   : > { %v1131_v44 = vadd.f32 %v1123_v19, %v1103_v49  ;;  %v879_v37 = vadd.f32 %v871_v3, %v851_v53  ;;  %v927_v0 = vmul.f32 %v1140_v56, %v2165_v20  ;;  %v816_v23 = vmul.f32 %v1027_v61, %v2065_v17  ;;  %v972_v53 = vld [vmem:[#allocation3 + $0x80] sm:$0xff] }
 0x15c   : > { %v1018_v43 = vadd.f32 %v1010_v15, %v990_v47  ;;  %v796_v13 = vadd.f32 %v788_v10, %v768_v34  ;;  %v1067_v54 = vmul.f32 %v2192_v29, %v1055_v1  ;;  %v955_v9 = vmul.f32 %v2169_v22, %v943_v30  ;;  %v1057_v10 = vld [vmem:[#allocation4 + $0x80] sm:$0xff] }
 0x15d   : > { %v1159_v4 = vadd.f32 %v1151_v16, %v1131_v44  ;;  %v907_v39 = vadd.f32 %v899_v50, %v879_v37  ;;  %v844_v12 = vmul.f32 %v1056_v5, %v2089_v52  ;;  %v1096_v42 = vmul.f32 %v2204_v32, %v1084_v2  ;;  %v1000_v16 = vld [vmem:[#allocation2 + $0x81] sm:$0xff] }
 0x15e   : > { %v1046_v21 = vadd.f32 %v1038_v55, %v1018_v43  ;;  %v824_v45 = vadd.f32 %v816_v23, %v796_v13  ;;  %v983_v17 = vmul.f32 %v2180_v63, %v971_v46  ;;  %v872_v1 = vmul.f32 %v1085_v7, %v2075_v33  ;;  %v1086_v43 = vld [vmem:[#allocation5 + $0x80] sm:$0xff] }
 0x15f   : > { %v1175_v62 = vsel %vm603_vm0, %v1159_v4, 0.0  ;;  %v935_v8 = vadd.f32 %v927_v0, %v907_v39  ;;  %v1124_v30 = vmul.f32 %v2208_v40, %v1112_v38  ;;  %v1011_v19 = vmul.f32 %v2184_v60, %v999_v18  ;;  %v1114_v39 = vld [vmem:[#allocation4 + $0x81] sm:$0xff] }
 0x160   : > { %1176 = vadd.xlane.f32.xlu0 %v1175_v62  ;;  %v1075_v24 = vadd.f32 %v1067_v54, %v1046_v21  ;;  %v852_v26 = vadd.f32 %v844_v12, %v824_v45  ;;  %v900_v52 = vmul.f32 %v1113_v35, %v2147_v6  ;;  %v1152_v2 = vmul.f32 %v2212_v41, %v1140_v56  ;;  %v1142_v21 = vld [vmem:[#allocation5 + $0x81] sm:$0xff] }
 0x161   : > { %v963_v36 = vadd.f32 %v955_v9, %v935_v8  ;;  %v1039_v46 = vmul.f32 %v2188_v28, %v1027_v61  ;;  %v928_v33 = vmul.f32 %v1141_v25, %v2165_v20  ;;  %v1068_v57 = vmul.f32 %v2192_v29, %v1056_v5  ;;  %v1028_v20 = vld [vmem:[#allocation3 + $0x81] sm:$0xff] }
 0x162   : > { %v1104_v58 = vadd.f32 %v1096_v42, %v1075_v24  ;;  %v880_v51 = vadd.f32 %v872_v1, %v852_v26  ;;  %v956_v18 = vmul.f32 %v2169_v22, %v944_v48  ;;  %v1097_v47 = vmul.f32 %v2204_v32, %v1085_v7 }
 0x163   : > { %v991_v14 = vadd.f32 %v983_v17, %v963_v36  ;;  %v984_v61 = vmul.f32 %v2180_v63, %v972_v53  ;;  %v1125_v37 = vmul.f32 %v2208_v40, %v1113_v35  ;;  %v1012_v34 = vmul.f32 %v2184_v60, %v1000_v16 }
 0x164   : > { %v1132_v31 = vadd.f32 %v1124_v30, %v1104_v58  ;;  %v908_v3 = vadd.f32 %v900_v52, %v880_v51  ;;  %v1069_v22 = vmul.f32 %v2192_v29, %v1057_v10  ;;  %v1153_v0 = vmul.f32 %v2212_v41, %v1141_v25 }
 0x165   : > { %v1019_v27 = vadd.f32 %v1011_v19, %v991_v14  ;;  %v1040_v4 = vmul.f32 %v2188_v28, %v1028_v20  ;;  %v1098_v23 = vmul.f32 %v2204_v32, %v1086_v43  ;;  %v1126_v60 = vmul.f32 %v2208_v40, %v1114_v39  ;;  %v1393_v28 = vld [vmem:[#allocation6] ss:$0 sm:$0xff] }
 0x166   : > { %v1160_v49 = vadd.f32 %v1152_v2, %v1132_v31  ;;  %v936_v11 = vadd.f32 %v928_v33, %v908_v3  ;;  %v1154_v7 = vmul.f32 %v2212_v41, %v1142_v21  ;;  %vm1299_vm5 = vcmask 1043459  }
 0x167   : > { %v1047_v38 = vadd.f32 %v1039_v46, %v1019_v27  ;;  %vm1301_vm6 = vcmask 1044484   ;;  %vm1303_vm7 = vcmask 1045509   ;;  %vm1305_vm8 = vcmask 1046534  }
 0x168   : > { %v1178_v6 = vsel %vm603_vm0, %v1160_v49, 0.0  ;;  %v964_v15 = vadd.f32 %v956_v18, %v936_v11  ;;  %vm1307_vm9 = vcmask 1047559   ;;  %vm1310_vm10 = vcmask 64512  }
 0x169   : > { %1179 = vadd.xlane.f32.xlu1 %v1178_v6  ;;  %v1076_v56 = vadd.f32 %v1068_v57, %v1047_v38 }
 0x16a   : > { %v992_v50 = vadd.f32 %v984_v61, %v964_v15 }
 0x16b   : > { %v1105_v44 = vadd.f32 %v1097_v47, %v1076_v56 }
 0x16c   : > { %v1020_v5 = vadd.f32 %v1012_v34, %v992_v50 }
 0x16d   : > { %v1133_v55 = vadd.f32 %v1125_v37, %v1105_v44 }
 0x16e   : > { %v1048_v63 = vadd.f32 %v1040_v4, %v1020_v5 }
 0x16f   : > { %v1161_v13 = vadd.f32 %v1153_v0, %v1133_v55  ;;  %v2428_v0 = vlaneseq }
 0x170   : > { %v1077_v9 = vadd.f32 %v1069_v22, %v1048_v63 }
 0x171   : > { %v1181_v54 = vsel %vm603_vm0, %v1161_v13, 0.0  ;;  %v1262_v5 = vand.u32 127, %v2428_v0 }
 0x172   : > { %1182 = vadd.xlane.f32.xlu0 %v1181_v54  ;;  %v1106_v29 = vadd.f32 %v1098_v23, %v1077_v9 }
 0x173   : > { %v1265_v63 = vsub.s32 %v1262_v5, %v2027_v59 }
 0x174   : > { %v1134_v62 = vadd.f32 %v1126_v60, %v1106_v29 }
 0x176   : > { %v1162_v8 = vadd.f32 %v1154_v7, %v1134_v62 }
 0x178   : > { %v1184_v45 = vsel %vm603_vm0, %v1162_v8, 0.0  ;;  %vm1295_vm0 = vcmask 1041409  }
 0x179   : > { %1185 = vadd.xlane.f32.xlu1 %v1184_v45 }
 0x188   : > { %1194 = vperm.xlu0 %1615, %v1393_v28  }
 0x1d0   : > { %v1165_v12 = vpop.xlane.xlu0 %1164 }
 0x1da   : > { %v1171_v24 = vpop.xlane.xlu1 %1170 }
 0x1df   : > { %v1168_v32 = vpop.xlane.xlu0 %1167 }
 0x1e6   : > { %v1174_v42 = vpop.xlane.xlu1 %1173 }
 0x1ed   : > { %v1177_v35 = vpop.xlane.xlu0 %1176 }
 0x1f6   : > { %v1180_v36 = vpop.xlane.xlu1 %1179 }
 0x1ff   : > { %v1183_v17 = vpop.xlane.xlu0 %1182 }
 0x206   : > { %v1186_v40 = vpop.xlane.xlu1 %1185 }
 0x207   : > { %v1195_v26 = vpop.permute.xlu0 %1194 }
 0x208   : > { %v1197_v1 = vadd.f32 %v1195_v26, %v1165_v12  ;;  %v1198_v58 = vadd.f32 %v1195_v26, %v1168_v32  ;;  %v1199_v30 = vadd.f32 %v1195_v26, %v1171_v24  ;;  %v1200_v41 = vadd.f32 %v1195_v26, %v1174_v42 }
 0x209   : > { %v1201_v25 = vadd.f32 %v1195_v26, %v1177_v35  ;;  %v1202_v14 = vadd.f32 %v1195_v26, %v1180_v36  ;;  %v1203_v19 = vadd.f32 %v1195_v26, %v1183_v17  ;;  %v1204_v51 = vadd.f32 %v1195_v26, %v1186_v40 }
 0x20a   : > { %v1205_v52 = vsub.f32 0.0, %v1197_v1  ;;  %v1206_v31 = vsub.f32 0.0, %v1198_v58  ;;  %v1207_v2 = vsub.f32 0.0, %v1199_v30  ;;  %v1208_v48 = vsub.f32 0.0, %v1200_v41 }
 0x20b   : > { %v1209_v27 = vsub.f32 0.0, %v1201_v25  ;;  %v1210_v46 = vsub.f32 0.0, %v1202_v14  ;;  %v1211_v3 = vsub.f32 0.0, %v1203_v19  ;;  %v1212_v38 = vsub.f32 0.0, %v1204_v51 }
 0x20c   : > { %v1213_v33 = vmul.f32 1.442695, %v1205_v52  ;;  %v1215_v49 = vmul.f32 1.442695, %v1206_v31  ;;  %v1217_v53 = vmul.f32 1.442695, %v1207_v2 }
 0x20d   : > { %v1219_v57 = vmul.f32 1.442695, %v1208_v48  ;;  %v1221_v11 = vmul.f32 1.442695, %v1209_v27  ;;  %v1223_v18 = vmul.f32 1.442695, %v1210_v46 }
 0x20e   : > { %1616 = vpow2.f32 %v1213_v33  ;;  %v1225_v6 = vmul.f32 1.442695, %v1211_v3  ;;  %v1227_v16 = vmul.f32 1.442695, %v1212_v38 }
 0x20f   : > { %1618 = vpow2.f32 %v1215_v49 }
 0x210   : > { %1620 = vpow2.f32 %v1217_v53 }
 0x211   : > { %1622 = vpow2.f32 %v1219_v57 }
 0x212   : > { %1624 = vpow2.f32 %v1221_v11 }
 0x213   : > { %1626 = vpow2.f32 %v1223_v18 }
 0x214   : > { %1628 = vpow2.f32 %v1225_v6 }
 0x215   : > { %1630 = vpow2.f32 %v1227_v16 }
 0x218   : > { %v1617_v56 = vpop.eup %1616 }
 0x219   : > { %v1619_v47 = vpop.eup %1618  ;;  %v1229_v15 = vadd.f32 1.0, %v1617_v56 }
 0x21a   : > { %v1621_v61 = vpop.eup %1620  ;;  %v1230_v10 = vadd.f32 1.0, %v1619_v47 }
 0x21b   : > { %v1623_v20 = vpop.eup %1622  ;;  %v1231_v44 = vadd.f32 1.0, %v1621_v61  ;;  %1632 = vrcp.f32 %v1229_v15 }
 0x21c   : > { %v1625_v37 = vpop.eup %1624  ;;  %v1232_v50 = vadd.f32 1.0, %v1623_v20  ;;  %1634 = vrcp.f32 %v1230_v10 }
 0x21d   : > { %v1627_v34 = vpop.eup %1626  ;;  %v1233_v22 = vadd.f32 1.0, %v1625_v37  ;;  %1636 = vrcp.f32 %v1231_v44 }
 0x21e   : > { %v1629_v43 = vpop.eup %1628  ;;  %v1234_v55 = vadd.f32 1.0, %v1627_v34  ;;  %1638 = vrcp.f32 %v1232_v50 }
 0x21f   : > { %v1631_v4 = vpop.eup %1630  ;;  %v1235_v39 = vadd.f32 1.0, %v1629_v43  ;;  %1640 = vrcp.f32 %v1233_v22 }
 0x220   : > { %v1236_v13 = vadd.f32 1.0, %v1631_v4  ;;  %1642 = vrcp.f32 %v1234_v55 }
 0x221   : > { %1644 = vrcp.f32 %v1235_v39 }
 0x222   : > { %1646 = vrcp.f32 %v1236_v13 }
 0x225   : > { %v1633_v23 = vpop.eup %1632 }
 0x226   : > { %v1635_v21 = vpop.eup %1634  ;;  %v1266_v54 = vrot.slane %v1633_v23, %v1265_v63 }
 0x227   : > { %v1637_v9 = vpop.eup %1636  ;;  %v1270_v60 = vrot.slane %v1635_v21, %v1265_v63 }
 0x228   : > { %v1639_v29 = vpop.eup %1638  ;;  %v1274_v7 = vrot.slane %v1637_v9, %v1265_v63 }
 0x229   : > { %v1641_v62 = vpop.eup %1640  ;;  %v1278_v8 = vrot.slane %v1639_v29, %v1265_v63  ;;  %v1296_v45 = vsel %vm1295_vm0, %v1270_v60, %v1266_v54 }
 0x22a   : > { %v1643_v59 = vpop.eup %1642  ;;  %v1282_v28 = vrot.slane %v1641_v62, %v1265_v63  ;;  %v1298_v12 = vsel %vm1297_vm4, %v1274_v7, %v1296_v45 }
 0x22b   : > { %v1645_v24 = vpop.eup %1644  ;;  %v1286_v32 = vrot.slane %v1643_v59, %v1265_v63  ;;  %v1300_v42 = vsel %vm1299_vm5, %v1278_v8, %v1298_v12 }
 0x22c   : > { %v1647_v35 = vpop.eup %1646  ;;  %v1290_v36 = vrot.slane %v1645_v24, %v1265_v63  ;;  %v1302_v17 = vsel %vm1301_vm6, %v1282_v28, %v1300_v42 }
 0x22d   : > { %v1294_v26 = vrot.slane %v1647_v35, %v1265_v63  ;;  %v1304_v40 = vsel %vm1303_vm7, %v1286_v32, %v1302_v17 }
 0x22e   : > { %v1306_v1 = vsel %vm1305_vm8, %v1290_v36, %v1304_v40 }
 0x22f   : > { %v1308_v58 = vsel %vm1307_vm9, %v1294_v26, %v1306_v1 }
 0x230   : > { %1311 = vst.msk [vmem:[%s220_s18] sm:$0xff] %vm1310_vm10, %v1308_v58 }
 0x231   : > { %1661 = shalt.err (!%p1658_p3)
}
 0x232   : > { %s1662_s10 = scalar_lea.hbm %s2375_s27, 128  ;;  %s1666_s13 = scalar_lea.hbm %s2424_s5, 256 }
 0x233   : > { %p1663_p4 = scmp.ne.s32.totalorder %s2375_s27, %s1662_s10  ;;  %p1667_p9 = scmp.lt.u32.totalorder %s2375_s27, %s2424_s5 }
 0x234   : > { %p1668_p10 = scmp.lt.u32.totalorder %s1666_s13, %s1662_s10  ;;  %p1670_p12 = scmp.lt.u32.totalorder %s1662_s10, %s2375_s27 }
 0x235   : > { %p1664_p7 = pnand %p1663_p4, %p1786_p5 }
 0x236   : > { %p1669_p11 = por %p1668_p10, %p1667_p9 }
 0x237   : > { %p1665_p8 = pneg %p1664_p7 }
 0x238   : > { %p1671_p13 = por %p1670_p12, %p1669_p11 }
 0x23a   : > { %p1672_p0 = pnand %p1671_p13, %p1665_p8 }
 0x23c   : > { %1675 = shalt.err (!%p1672_p0)
}
 0x23d   : > { %1574 = dma.vmem_to_hbm [thread:$0]  (%p1786_p5), %s2377_s19, 128, %s2375_s27, %s1313_s4  }
 0x23e PF: > { %p1580_p1 = scmp.ge.s32.totalorder %s1710_s23, 2  ;;  %s1338_s16 = sand.u32 1, %s1698_s20  }
 0x23f   : > { %s1339_s17 = scalar_lea.sflag [#allocation8], %s1338_s16 }
 0x240   : > { %p1577_p2 = pnand %p1580_p1, %p1790_p6 }
 0x242   : > { %1693 = dma.done.wait (!%p1577_p2), %s1339_s17, 128  }
 0x243   : > { %1695 = vsyncadd (!%p1577_p2), %s1339_s17, 4294967168  ;;  %p17_p3 = scmp.ge.s32.totalorder %s1773_s25, 4   ;;  %s2429_s20 = smov %s1702_s21 }
 0x244   : > { %s2430_s21 = smov %s1706_s22  ;;  %s2431_s22 = smov %s1784_s28 }
 0x245   : > { %s2432_s23 = smov %s1773_s25  ;;  %19 = sbr.rel (!%p17_p3) target bundleno = 6 (0x6), region = 79 }
 0x24c   :  { %1344 = vsyncpa [#allocation8], 1 }
 0x24d   :  { %1346 = vsyncpa [#allocation8 + $0x1], 1 }

</bundles_post_ra>
